<compile_context>
chip_gen: v7x
topology: tpu7x:2x2x1
jax: 0.10.0
libtpu: 0.0.40
codegen_flags: <defaults>
</compile_context>

<pallas_src>
import functools

import jax
import jax.numpy as jnp
from jax.experimental import pallas as pl
from jax.experimental.pallas import tpu as pltpu

_PARALLEL = pltpu.CompilerParams(dimension_semantics=("parallel",))
_ARBITRARY = pltpu.CompilerParams(dimension_semantics=("arbitrary",))


# --------------------------------------------------------------------------
# Small helpers
# --------------------------------------------------------------------------
def _round_up(x, m):
    return (x + m - 1) // m * m


def _row_grid(m, tm_max=512):
    """Row-tile size, padded row count and grid size for [M, ...] kernels."""
    tm = min(tm_max, _round_up(m, 16))        # 16-row alignment (bf16 sublane pack)
    mp = _round_up(m, tm)
    return tm, mp, mp // tm


def _pad_rows(a, mp):
    m = a.shape[0]
    if m == mp:
        return a
    return jnp.pad(a, ((0, mp - m), (0, 0)))  # zero-pad rows (neutral for sums)


def _im2col(x_nhwc, kh, kw):
    """Stride-1 im2col of an already padded NHWC tensor (plain-JAX glue)."""
    n, hp, wp, c = x_nhwc.shape
    ho, wo = hp - kh + 1, wp - kw + 1
    cols = []
    for i in range(kh):
        for j in range(kw):
            cols.append(x_nhwc[:, i:i + ho, j:j + wo, :])
    patches = jnp.concatenate(cols, axis=-1)              # [N, Ho, Wo, kh*kw*C]
    return patches.reshape(n * ho * wo, kh * kw * c), (n, ho, wo)


# --------------------------------------------------------------------------
# Pallas kernels
# --------------------------------------------------------------------------
def _mm_bias_kernel(x_ref, w_ref, b_ref, o_ref):
    """o = x @ w + b.  x:[tm,K] bf16, w:[K,N] bf16, b:[1,N] f32 -> fp32 acc."""
    acc = jnp.dot(x_ref[...], w_ref[...], preferred_element_type=jnp.float32)
    o_ref[...] = (acc + b_ref[...]).astype(o_ref.dtype)


def _res_layer_kernel(p_ref, w1_ref, w2_ref, x_ref, o_ref, *, final_relu):
    """Fused VQ-VAE residual layer on a row tile:
       out = [relu]( x + relu(relu(P) @ W1) @ W2 ),  P = im2col(x) (pre-ReLU).
       The input ReLU is applied on the patches (relu(0)=0 commutes with the
       zero padding), so no separate activation pass is needed in XLA."""
    p = jnp.maximum(p_ref[...], 0)                       # ReLU on patches (VPU)
    h = jnp.dot(p, w1_ref[...], preferred_element_type=jnp.float32)
    h = jnp.maximum(h, 0.0).astype(jnp.bfloat16)
    y = jnp.dot(h, w2_ref[...], preferred_element_type=jnp.float32)
    y = y + x_ref[...].astype(jnp.float32)
    if final_relu:
        y = jnp.maximum(y, 0.0)
    o_ref[...] = y.astype(o_ref.dtype)


def _deconv_bn_stats_kernel(p_ref, w_ref, o_ref, s_ref):
    """Sub-pixel deconv GEMM fused with BN statistics accumulation.

    o = p @ w (no bias: training-mode BN cancels it), and s accumulates
    per-column [sum; sumsq] into a resident [2, 4*Cout] output across the
    "arbitrary" row grid.  Zero-padded rows contribute zero to both."""
    @pl.when(pl.program_id(0) == 0)
    def _():
        s_ref[...] = jnp.zeros_like(s_ref)
    acc = jnp.dot(p_ref[...], w_ref[...], preferred_element_type=jnp.float32)
    o_ref[...] = acc.astype(o_ref.dtype)
    s_ref[...] += jnp.concatenate(
        [jnp.sum(acc, axis=0, keepdims=True),
         jnp.sum(acc * acc, axis=0, keepdims=True)], axis=0)


def _scale_offset_relu_kernel(x_ref, sc_ref, of_ref, o_ref):
    """Pass 2 of BN: y = relu(x * scale + offset), scale/offset precomputed."""
    x = x_ref[...].astype(jnp.float32)
    y = x * sc_ref[...] + of_ref[...]
    o_ref[...] = jnp.maximum(y, 0.0).astype(o_ref.dtype)


# --------------------------------------------------------------------------
# Kernel wrappers
# --------------------------------------------------------------------------
def _mm_bias(x2d, w2d, bias_row, out_dtype):
    """Row-tiled, pipelined (x @ w + b)."""
    m, k = x2d.shape
    n_out = w2d.shape[1]
    tm, mp, g = _row_grid(m)
    out = pl.pallas_call(
        _mm_bias_kernel,
        out_shape=jax.ShapeDtypeStruct((mp, n_out), out_dtype),
        grid=(g,),
        in_specs=[pl.BlockSpec((tm, k), lambda i: (i, 0)),
                  pl.BlockSpec((k, n_out), lambda i: (0, 0)),
                  pl.BlockSpec((1, n_out), lambda i: (0, 0))],
        out_specs=pl.BlockSpec((tm, n_out), lambda i: (i, 0)),
        compiler_params=_PARALLEL,
    )(_pad_rows(x2d, mp), w2d, bias_row)
    return out[:m]


def residual_layer(x_nhwc, w1, w2, final_relu, out_dtype=jnp.bfloat16):
    """x + Conv1x1(ReLU(Conv3x3(ReLU(x))))  [+ final stack ReLU], fully fused."""
    n, h, w, cin = x_nhwc.shape
    hdim = w1.shape[0]
    m = n * h * w
    xp = jnp.pad(x_nhwc, ((0, 0), (1, 1), (1, 1), (0, 0)))   # pre-ReLU pad (relu in-kernel)
    cols, _ = _im2col(xp, 3, 3)                               # [M, 9*Cin]
    cols = cols.astype(jnp.bfloat16)
    w1_2d = jnp.transpose(w1, (2, 3, 1, 0)).reshape(9 * cin, hdim).astype(jnp.bfloat16)
    w2_2d = jnp.transpose(w2, (2, 3, 1, 0)).reshape(hdim, cin).astype(jnp.bfloat16)
    x2d = x_nhwc.reshape(m, cin)

    tm, mp, g = _row_grid(m)
    out = pl.pallas_call(
        functools.partial(_res_layer_kernel, final_relu=final_relu),
        out_shape=jax.ShapeDtypeStruct((mp, cin), out_dtype),
        grid=(g,),
        in_specs=[pl.BlockSpec((tm, 9 * cin), lambda i: (i, 0)),
                  pl.BlockSpec((9 * cin, hdim), lambda i: (0, 0)),
                  pl.BlockSpec((hdim, cin), lambda i: (0, 0)),
                  pl.BlockSpec((tm, cin), lambda i: (i, 0))],
        out_specs=pl.BlockSpec((tm, cin), lambda i: (i, 0)),
        compiler_params=_PARALLEL,
    )(_pad_rows(cols, mp), w1_2d, w2_2d, _pad_rows(x2d, mp))
    return out[:m].reshape(n, h, w, cin)


def _deconv_subpixel_weight(w_t):
    """Combined sub-pixel weight for ConvTranspose2d(k=4, s=2, p=1).

    Returns [9*Cin, 4*Cout]: rows follow the 3x3 im2col tap order (di, dj, ci),
    columns follow ((a*2 + b) * Cout + co) where (a, b) is the output phase.
    out[n, 2p+a, 2q+b, co] = sum_{di,dj,ci} x_pad[n, p+di, q+dj, ci] * Wc[...]
    with kh = 3 + a - 2*di, kw = 3 + b - 2*dj (zero when out of [0,4)).
    """
    cin, cout = w_t.shape[0], w_t.shape[1]
    blocks = []
    for di in range(3):
        for dj in range(3):
            cols = []
            for a in range(2):
                for b in range(2):
                    kh = 3 + a - 2 * di
                    kw = 3 + b - 2 * dj
                    if 0 <= kh <= 3 and 0 <= kw <= 3:
                        cols.append(w_t[:, :, kh, kw])        # [Cin, Cout]
                    else:
                        cols.append(jnp.zeros((cin, cout), w_t.dtype))
            blocks.append(jnp.concatenate(cols, axis=1))      # [Cin, 4*Cout]
    wc = jnp.stack(blocks, axis=0)                            # [9, Cin, 4*Cout]
    return wc.reshape(9 * cin, 4 * cout)


def _phase_unshuffle(out2, n, h, w, cout):
    """[N*H*W, 4*Cout] (phase-major columns) -> NHWC [N, 2H, 2W, Cout]."""
    y = out2.reshape(n, h, w, 2, 2, cout)
    y = jnp.transpose(y, (0, 1, 3, 2, 4, 5))
    return y.reshape(n, 2 * h, 2 * w, cout)


def deconv_bn_relu_block(x_nhwc, w_t, gamma, beta, eps=1e-5,
                         out_dtype=jnp.bfloat16):
    """Non-final decoder block: ConvTranspose2d(4,2,1) + BatchNorm2d + ReLU.

    Pass 1: fused sub-pixel GEMM + BN sum/sumsq accumulation (one pallas_call).
    Pass 2: tiled y*scale+offset+ReLU on the pre-interleave [M, 4*Cout] layout.
    The conv bias is skipped (training-mode BN cancels it exactly)."""
    cin, cout = w_t.shape[0], w_t.shape[1]
    n, h, w, _ = x_nhwc.shape
    m = n * h * w
    c4 = 4 * cout
    xp = jnp.pad(x_nhwc, ((0, 0), (1, 1), (1, 1), (0, 0)))
    cols, _ = _im2col(xp, 3, 3)                               # [M, 9*Cin]
    cols = cols.astype(jnp.bfloat16)
    wc = _deconv_subpixel_weight(w_t).astype(jnp.bfloat16)    # [9*Cin, 4*Cout]

    tm, mp, g = _row_grid(m)
    y2, stats4 = pl.pallas_call(
        _deconv_bn_stats_kernel,
        out_shape=(jax.ShapeDtypeStruct((mp, c4), out_dtype),
                   jax.ShapeDtypeStruct((2, c4), jnp.float32)),
        grid=(g,),
        in_specs=[pl.BlockSpec((tm, 9 * cin), lambda i: (i, 0)),
                  pl.BlockSpec((9 * cin, c4), lambda i: (0, 0))],
        out_specs=(pl.BlockSpec((tm, c4), lambda i: (i, 0)),
                   pl.BlockSpec((2, c4), lambda i: (0, 0))),   # resident accumulator
        compiler_params=_ARBITRARY,
    )(_pad_rows(cols, mp), wc)

    # Fold the 4 sub-pixel phases into per-channel stats; tiny [2, Cout] math in XLA.
    stats = stats4.reshape(2, 4, cout).sum(axis=1)            # [2, Cout]
    count = float(m * 4)                                      # N * Hout * Wout
    mean = stats[0] / count
    var = stats[1] / count - mean * mean                      # biased var (BN training)
    scale = gamma.astype(jnp.float32) * jax.lax.rsqrt(var + eps)
    offset = beta.astype(jnp.float32) - mean * scale
    scale4 = jnp.tile(scale, 4).reshape(1, c4)
    offset4 = jnp.tile(offset, 4).reshape(1, c4)

    out = pl.pallas_call(
        _scale_offset_relu_kernel,
        out_shape=jax.ShapeDtypeStruct((mp, c4), out_dtype),
        grid=(g,),
        in_specs=[pl.BlockSpec((tm, c4), lambda i: (i, 0)),
                  pl.BlockSpec((1, c4), lambda i: (0, 0)),
                  pl.BlockSpec((1, c4), lambda i: (0, 0))],
        out_specs=pl.BlockSpec((tm, c4), lambda i: (i, 0)),
        compiler_params=_PARALLEL,
    )(y2, scale4, offset4)
    return _phase_unshuffle(out[:m], n, h, w, cout)


def deconv_final_block(x_nhwc, w_t, bias, out_dtype=jnp.float32):
    """Final decoder block: ConvTranspose2d(4,2,1) with bias, no BN/ReLU."""
    cin, cout = w_t.shape[0], w_t.shape[1]
    n, h, w, _ = x_nhwc.shape
    xp = jnp.pad(x_nhwc, ((0, 0), (1, 1), (1, 1), (0, 0)))
    cols, _ = _im2col(xp, 3, 3)
    cols = cols.astype(jnp.bfloat16)
    wc = _deconv_subpixel_weight(w_t).astype(jnp.bfloat16)
    bias4 = jnp.tile(bias, 4).reshape(1, 4 * cout).astype(jnp.float32)
    y2 = _mm_bias(cols, wc, bias4, out_dtype)                 # [N*H*W, 4*Cout]
    return _phase_unshuffle(y2, n, h, w, cout)


# --------------------------------------------------------------------------
# Parameter construction (deterministic, synthetic)
# --------------------------------------------------------------------------
def init_params(key, in_dim, hidden_dim, out_dim, num_reslayers=1,
                level='top -> bottom'):
    params = {'res': [], 'dec': []}
    hdim = in_dim // 2
    for _ in range(num_reslayers):
        key, k1, k2 = jax.random.split(key, 3)
        w1 = 0.1 * jax.random.normal(k1, (hdim, in_dim, 3, 3), jnp.float32)  # 3x3, no bias
        w2 = 0.1 * jax.random.normal(k2, (in_dim, hdim, 1, 1), jnp.float32)  # 1x1, no bias
        params['res'].append((w1, w2))

    def make_deconv(k, cin, cout, final):
        k1, k2, k3, k4 = jax.random.split(k, 4)
        w = 0.1 * jax.random.normal(k1, (cin, cout, 4, 4), jnp.float32)
        b = 0.05 * jax.random.normal(k2, (cout,), jnp.float32)
        bn = None
        if not final:
            gamma = 1.0 + 0.1 * jax.random.normal(k3, (cout,), jnp.float32)
            beta = 0.1 * jax.random.normal(k4, (cout,), jnp.float32)
            bn = (gamma, beta)
        return {'w': w, 'b': b, 'bn': bn}

    if level == 'top -> bottom':
        key, k = jax.random.split(key)
        params['dec'].append(make_deconv(k, in_dim, out_dim, final=True))
    elif level == 'bottom -> image':
        specs = [(in_dim, hidden_dim * 2, False),
                 (hidden_dim * 2, hidden_dim * 2, False),
                 (hidden_dim * 2, hidden_dim, False),
                 (hidden_dim, out_dim, True)]
        for ci, co, fin in specs:
            key, k = jax.random.split(key)
            params['dec'].append(make_deconv(k, ci, co, fin))
    else:
        raise ValueError(level)
    return params


# --------------------------------------------------------------------------
# Forward pass (Pallas) and pure-JAX reference
# --------------------------------------------------------------------------
def vq_decoder2d_forward(params, x_nchw):
    x = jnp.transpose(x_nchw, (0, 2, 3, 1)).astype(jnp.bfloat16)   # NCHW -> NHWC, bf16
    # ResidualStack (each layer fully fused; stack-final ReLU fused into last layer)
    nres = len(params['res'])
    if nres == 0:
        x = jnp.maximum(x, 0.0)
    for li, (w1, w2) in enumerate(params['res']):
        x = residual_layer(x, w1, w2, final_relu=(li == nres - 1))
    # Decoder: sub-pixel deconv blocks (BN stats fused into the GEMM for non-final).
    for blk in params['dec']:
        if blk['bn'] is None:
            x = deconv_final_block(x, blk['w'], blk['b'], out_dtype=jnp.float32)
        else:
            x = deconv_bn_relu_block(x, blk['w'], blk['bn'][0], blk['bn'][1],
                                     out_dtype=jnp.bfloat16)
    return jnp.transpose(x, (0, 3, 1, 2)).astype(jnp.float32)       # NHWC -> NCHW


def vq_decoder2d_reference(params, x_nchw):
    dn = ('NHWC', 'HWIO', 'NHWC')
    x = jnp.transpose(x_nchw, (0, 2, 3, 1))
    for (w1, w2) in params['res']:
        h = jax.nn.relu(x)
        h = jax.lax.conv_general_dilated(h, jnp.transpose(w1, (2, 3, 1, 0)),
                                         (1, 1), [(1, 1), (1, 1)],
                                         dimension_numbers=dn)
        h = jax.nn.relu(h)
        h = jax.lax.conv_general_dilated(h, jnp.transpose(w2, (2, 3, 1, 0)),
                                         (1, 1), [(0, 0), (0, 0)],
                                         dimension_numbers=dn)
        x = x + h
    x = jax.nn.relu(x)
    for blk in params['dec']:
        w_t = blk['w']                                    # [Cin, Cout, KH, KW]
        kh, kw = w_t.shape[2], w_t.shape[3]
        w_hwio = jnp.transpose(w_t[:, :, ::-1, ::-1], (2, 3, 0, 1))
        x = jax.lax.conv_general_dilated(
            x, w_hwio, (1, 1),
            [(kh - 1 - 1, kh - 1 - 1), (kw - 1 - 1, kw - 1 - 1)],
            lhs_dilation=(2, 2), dimension_numbers=dn)
        x = x + blk['b']
        if blk['bn'] is not None:
            gamma, beta = blk['bn']
            mean = jnp.mean(x, axis=(0, 1, 2), keepdims=True)
            var = jnp.mean((x - mean) ** 2, axis=(0, 1, 2), keepdims=True)
            x = (x - mean) * jax.lax.rsqrt(var + 1e-5) * gamma + beta
            x = jax.nn.relu(x)
    return jnp.transpose(x, (0, 3, 1, 2))


def _check(out, ref, name):
    err = float(jnp.max(jnp.abs(out - ref)))
    scale = float(jnp.max(jnp.abs(ref))) + 1e-6
    # bf16 MXU operands / bf16 inter-layer activations -> slightly looser bound
    assert err <= 3e-2 * scale + 1e-3, f"{name}: max err {err} vs scale {scale}"


# --------------------------------------------------------------------------
if __name__ == "__main__":
    key = jax.random.PRNGKey(0)
    fwd = jax.jit(vq_decoder2d_forward)

    # ---- level = 'top -> bottom' (ResidualStack + 1 deconv) ----
    key, kp, kx = jax.random.split(key, 3)
    params_tb = init_params(kp, in_dim=8, hidden_dim=16, out_dim=8,
                            num_reslayers=1, level='top -> bottom')
    x_tb = jax.random.normal(kx, (2, 8, 16, 16), jnp.float32)       # NCHW
    out_tb = jax.block_until_ready(fwd(params_tb, x_tb))
    assert out_tb.shape == (2, 8, 32, 32), out_tb.shape
    _check(out_tb, vq_decoder2d_reference(params_tb, x_tb), "top->bottom")

    # ---- level = 'bottom -> image' (4 deconv blocks with BN+ReLU) ----
    key, kp2, kx2 = jax.random.split(key, 3)
    params_bi = init_params(kp2, in_dim=8, hidden_dim=4, out_dim=3,
                            num_reslayers=1, level='bottom -> image')
    x_bi = jax.random.normal(kx2, (2, 8, 4, 4), jnp.float32)         # NCHW
    out_bi = jax.block_until_ready(fwd(params_bi, x_bi))
    assert out_bi.shape == (2, 3, 64, 64), out_bi.shape
    _check(out_bi, vq_decoder2d_reference(params_bi, x_bi), "bottom->image")

    print("KERNEL_OK")
</pallas_src>

<mosaic_0001>
module attributes {stable_mosaic.version = 11 : i64} {
  func.func @_res_layer_kernel(%arg0: i32, %arg1: memref<512x72xbf16, #tpu.memory_space<vmem>>, %arg2: memref<72x4xbf16, #tpu.memory_space<vmem>>, %arg3: memref<4x8xbf16, #tpu.memory_space<vmem>>, %arg4: memref<512x8xbf16, #tpu.memory_space<vmem>>, %arg5: memref<512x8xbf16, #tpu.memory_space<vmem>>) attributes {dimension_semantics = [#tpu.dimension_semantics<parallel>], iteration_bounds = array<i64: 1>, scalar_prefetch = 0 : i64, scratch_operands = 0 : i64, tpu.core_type = #tpu.core_type<tc>, window_params = [{transform_indices = @transform_0, window_bounds = array<i64: 512, 72>}, {pipeline_mode = #tpu.pipeline_mode<synchronous>, transform_indices = @transform_1, window_bounds = array<i64: 72, 4>}, {pipeline_mode = #tpu.pipeline_mode<synchronous>, transform_indices = @transform_2, window_bounds = array<i64: 4, 8>}, {transform_indices = @transform_3, window_bounds = array<i64: 512, 8>}, {transform_indices = @transform_4, window_bounds = array<i64: 512, 8>}]} {
    %c0 = arith.constant 0 : index
    %c0_0 = arith.constant 0 : index
    %0 = vector.load %arg1[%c0, %c0_0] : memref<512x72xbf16, #tpu.memory_space<vmem>>, vector<512x72xbf16>
    %cst = arith.constant 0.000000e+00 : bf16
    %1 = vector.broadcast %cst : bf16 to vector<512x72xbf16>
    %2 = arith.maximumf %0, %1 : vector<512x72xbf16>
    %c0_1 = arith.constant 0 : index
    %c0_2 = arith.constant 0 : index
    %3 = vector.load %arg2[%c0_1, %c0_2] : memref<72x4xbf16, #tpu.memory_space<vmem>>, vector<72x4xbf16>
    %cst_3 = arith.constant dense<0.000000e+00> : vector<512x4xf32>
    %4 = tpu.matmul %2, %3, %cst_3 {dimension_numbers = #tpu.dot_dimension_numbers<[1], [0], [0], [1], [0, 0, 1, 1], [], []>} : vector<512x72xbf16>, vector<72x4xbf16>, vector<512x4xf32> -> vector<512x4xf32>
    %cst_4 = arith.constant 0.000000e+00 : f32
    %5 = vector.broadcast %cst_4 : f32 to vector<512x4xf32>
    %6 = arith.maximumf %4, %5 : vector<512x4xf32>
    %7 = arith.truncf %6 : vector<512x4xf32> to vector<512x4xbf16>
    %c0_5 = arith.constant 0 : index
    %c0_6 = arith.constant 0 : index
    %8 = vector.load %arg3[%c0_5, %c0_6] : memref<4x8xbf16, #tpu.memory_space<vmem>>, vector<4x8xbf16>
    %cst_7 = arith.constant dense<0.000000e+00> : vector<512x8xf32>
    %9 = tpu.matmul %7, %8, %cst_7 {dimension_numbers = #tpu.dot_dimension_numbers<[1], [0], [0], [1], [0, 0, 1, 1], [], []>} : vector<512x4xbf16>, vector<4x8xbf16>, vector<512x8xf32> -> vector<512x8xf32>
    %c0_8 = arith.constant 0 : index
    %c0_9 = arith.constant 0 : index
    %10 = vector.load %arg4[%c0_8, %c0_9] : memref<512x8xbf16, #tpu.memory_space<vmem>>, vector<512x8xbf16>
    %11 = arith.extf %10 : vector<512x8xbf16> to vector<512x8xf32>
    %12 = arith.addf %9, %11 : vector<512x8xf32>
    %cst_10 = arith.constant 0.000000e+00 : f32
    %13 = vector.broadcast %cst_10 : f32 to vector<512x8xf32>
    %14 = arith.maximumf %12, %13 : vector<512x8xf32>
    %15 = arith.truncf %14 : vector<512x8xf32> to vector<512x8xbf16>
    %c0_11 = arith.constant 0 : index
    %c0_12 = arith.constant 0 : index
    %16 = vector.load %arg5[%c0_11, %c0_12] : memref<512x8xbf16, #tpu.memory_space<vmem>>, vector<512x8xbf16>
    tpu.vector_store %arg5[%c0_11, %c0_12], %15 {strides = array<i32>} : memref<512x8xbf16, #tpu.memory_space<vmem>>, vector<512x8xbf16>,
    return
  }
  func.func @transform_0(%arg0: i32) -> (i32, i32) {
    %c0_i32 = arith.constant 0 : i32
    %c0_i32_0 = arith.constant 0 : i32
    return %arg0, %c0_i32 : i32, i32
  }
  func.func @transform_1(%arg0: i32) -> (i32, i32) {
    %c0_i32 = arith.constant 0 : i32
    %c0_i32_0 = arith.constant 0 : i32
    %c0_i32_1 = arith.constant 0 : i32
    return %c0_i32, %c0_i32_0 : i32, i32
  }
  func.func @transform_2(%arg0: i32) -> (i32, i32) {
    %c0_i32 = arith.constant 0 : i32
    %c0_i32_0 = arith.constant 0 : i32
    %c0_i32_1 = arith.constant 0 : i32
    return %c0_i32, %c0_i32_0 : i32, i32
  }
  func.func @transform_3(%arg0: i32) -> (i32, i32) {
    %c0_i32 = arith.constant 0 : i32
    %c0_i32_0 = arith.constant 0 : i32
    return %arg0, %c0_i32 : i32, i32
  }
  func.func @transform_4(%arg0: i32) -> (i32, i32) {
    %c0_i32 = arith.constant 0 : i32
    %c0_i32_0 = arith.constant 0 : i32
    return %arg0, %c0_i32 : i32, i32
  }
}

module attributes {stable_mosaic.version = 11 : i64} {
  func.func @_mm_bias_kernel(%arg0: i32, %arg1: memref<512x72xbf16, #tpu.memory_space<vmem>>, %arg2: memref<72x32xbf16, #tpu.memory_space<vmem>>, %arg3: memref<1x32xf32, #tpu.memory_space<vmem>>, %arg4: memref<512x32xf32, #tpu.memory_space<vmem>>) attributes {dimension_semantics = [#tpu.dimension_semantics<parallel>], iteration_bounds = array<i64: 1>, scalar_prefetch = 0 : i64, scratch_operands = 0 : i64, tpu.core_type = #tpu.core_type<tc>, window_params = [{transform_indices = @transform_0, window_bounds = array<i64: 512, 72>}, {pipeline_mode = #tpu.pipeline_mode<synchronous>, transform_indices = @transform_1, window_bounds = array<i64: 72, 32>}, {pipeline_mode = #tpu.pipeline_mode<synchronous>, transform_indices = @transform_2, window_bounds = array<i64: 1, 32>}, {transform_indices = @transform_3, window_bounds = array<i64: 512, 32>}]} {
    %c0 = arith.constant 0 : index
    %c0_0 = arith.constant 0 : index
    %0 = vector.load %arg1[%c0, %c0_0] : memref<512x72xbf16, #tpu.memory_space<vmem>>, vector<512x72xbf16>
    %c0_1 = arith.constant 0 : index
    %c0_2 = arith.constant 0 : index
    %1 = vector.load %arg2[%c0_1, %c0_2] : memref<72x32xbf16, #tpu.memory_space<vmem>>, vector<72x32xbf16>
    %cst = arith.constant dense<0.000000e+00> : vector<512x32xf32>
    %2 = tpu.matmul %0, %1, %cst {dimension_numbers = #tpu.dot_dimension_numbers<[1], [0], [0], [1], [0, 0, 1, 1], [], []>} : vector<512x72xbf16>, vector<72x32xbf16>, vector<512x32xf32> -> vector<512x32xf32>
    %c0_3 = arith.constant 0 : index
    %c0_4 = arith.constant 0 : index
    %3 = vector.load %arg3[%c0_3, %c0_4] : memref<1x32xf32, #tpu.memory_space<vmem>>, vector<1x32xf32>
    %4 = vector.broadcast %3 : vector<1x32xf32> to vector<512x32xf32>
    %5 = arith.addf %2, %4 : vector<512x32xf32>
    %c0_5 = arith.constant 0 : index
    %c0_6 = arith.constant 0 : index
    %6 = vector.load %arg4[%c0_5, %c0_6] : memref<512x32xf32, #tpu.memory_space<vmem>>, vector<512x32xf32>
    tpu.vector_store %arg4[%c0_5, %c0_6], %5 {strides = array<i32>} : memref<512x32xf32, #tpu.memory_space<vmem>>, vector<512x32xf32>,
    return
  }
  func.func @transform_0(%arg0: i32) -> (i32, i32) {
    %c0_i32 = arith.constant 0 : i32
    %c0_i32_0 = arith.constant 0 : i32
    return %arg0, %c0_i32 : i32, i32
  }
  func.func @transform_1(%arg0: i32) -> (i32, i32) {
    %c0_i32 = arith.constant 0 : i32
    %c0_i32_0 = arith.constant 0 : i32
    %c0_i32_1 = arith.constant 0 : i32
    return %c0_i32, %c0_i32_0 : i32, i32
  }
  func.func @transform_2(%arg0: i32) -> (i32, i32) {
    %c0_i32 = arith.constant 0 : i32
    %c0_i32_0 = arith.constant 0 : i32
    %c0_i32_1 = arith.constant 0 : i32
    return %c0_i32, %c0_i32_0 : i32, i32
  }
  func.func @transform_3(%arg0: i32) -> (i32, i32) {
    %c0_i32 = arith.constant 0 : i32
    %c0_i32_0 = arith.constant 0 : i32
    return %arg0, %c0_i32 : i32, i32
  }
}

</mosaic_0001>

<bundles_post_ra>
// kernel: tile.8
= control target key start
LH: loop header
LB: loop body
LE: loop exit
PB: predicated region body
PF: predicated region fallthrough
CT: control target
= control target key end

     0   :  { %2 = vsyncpa [#allocation1], 0  ;;  %s44_s6 = smov [#allocation0]   ;;  %s70_s0 = inlined_call_operand.hbm [shape: f32[8], index: 0, kind: input, shape index: {}]   ;;  %s71_s1 = inlined_call_operand.vmem [shape: f32[4,8], index: 1, kind: output, shape index: {}]  }
   0x1   :  { %s9_s7 = sshll.u32 %s44_s6, 4  ;;  %s20_s10 = scalar_lea.hbm %s70_s0, 16  ;;  %s10_s7 = int_to_ptr.vmem [resolvable:$true] %s9_s7 }
   0x2   :  { %p21_p0 = scmp.ne.s32.totalorder %s70_s0, %s20_s10  ;;  %p24_p1 = scmp.lt.u32.totalorder %s20_s10, %s70_s0 }
   0x4   :  { %p26_p2 = pnand %p24_p1, %p21_p0 }
   0x6   :  { %29 = shalt.err (!%p26_p2)
}
   0x7   :  { %s30_s15 = scalar_lea.vmem %s10_s7, 16  ;;  %s34_s16 = scalar_lea.vmem %s10_s7, 32 }
   0x8   :  { %p31_p3 = scmp.ne.s32.totalorder %s10_s7, %s30_s15  ;;  %p35_p4 = scmp.lt.s32.totalorder %s10_s7, %s10_s7 }
   0x9   :  { %p36_p5 = scmp.lt.s32.totalorder %s34_s16, %s30_s15 }
   0xb   :  { %p37_p6 = por %p36_p5, %p35_p4 }
   0xd   :  { %p38_p7 = pnand %p37_p6, %p31_p3 }
   0xf   :  { %41 = shalt.err (!%p38_p7)
}
  0x10   :  { %12 = dma.hbm_to_vmem [thread:$0]  %s70_s0, 16, %s10_s7, [#allocation1]  }
  0x11   :  { %42 = dma.done.wait [#allocation1], 16  }
  0x12   :  { %43 = vsyncadd [#allocation1], 4294967280  ;;  %v16_v0 = vld [vmem:[#allocation0] ss:$0 sm:$0xff] }
  0x13   :  { %17 = vst [vmem:[%s71_s1] sm:$0xf] %v16_v0 }
  0x14   :  { %18 = vsyncpa [#allocation1], 1 }

// kernel: tile.9
= control target key start
LH: loop header
LB: loop body
LE: loop exit
PB: predicated region body
PF: predicated region fallthrough
CT: control target
= control target key end

     0   :  { %vm7_vm0 = vcmask 64512   ;;  %s37_s8 = smov 8   ;;  %s38_s9 = smov 16   ;;  %vm13_vm1 = vcmask 261312   ;;  %vm19_vm2 = vcmask 195712   ;;  %vm25_vm3 = vcmask 130112   ;;  %s55_s0 = inlined_call_operand.vmem [shape: f32[4,8], index: 0, kind: input, shape index: {}]   ;;  %s56_s1 = inlined_call_operand.vmem [shape: f32[1,32], index: 1, kind: output, shape index: {}]  }
   0x1   :  { %v4_v0 = vld [vmem:[%s55_s0] sm:$0xf]  ;;  %s36_s0 = smov 24  }
   0x2   :  { %5 = vst [vmem:[#allocation1] sm:$0xf] %v4_v0 }
   0x9   :  { %v10_v1 = vld [vmem:[#allocation1 + $0x3] sm:$0x1]   ;;  %v22_v2 = vld [vmem:[#allocation1 + $0x1] sm:$0x1]   ;;  %v6_v3 = vld [vmem:[#allocation1] sm:$0x1]  }
   0xa   :  { %11 = vrot.lane.b32.xlu0 %v10_v1, %s36_s0  ;;  %23 = vrot.lane.b32.xlu1 %v22_v2, %s37_s8  ;;  %v16_v4 = vld [vmem:[#allocation1 + $0x2] sm:$0x1]   ;;  %8 = vst.msk [vmem:[#allocation0] sm:$0x1] %vm7_vm0, %v6_v3  }
   0xe   :  { %17 = vrot.lane.b32.xlu0 %v16_v4, %s38_s9 }
  0x7c   :  { %v12_v5 = vpop.permute.xlu0 %11   ;;  %v24_v6 = vpop.permute.xlu1 %23  }
  0x7d   :  { %14 = vst.msk [vmem:[#allocation0] sm:$0x1] %vm13_vm1, %v12_v5  }
  0x80   :  { %v18_v7 = vpop.permute.xlu0 %17  }
  0x81   :  { %20 = vst.msk [vmem:[#allocation0] sm:$0x1] %vm19_vm2, %v18_v7  }
  0x82   :  { %26 = vst.msk [vmem:[#allocation0] sm:$0x1] %vm25_vm3, %v24_v6  }
  0x89   :  { %v30_v8 = vld [vmem:[#allocation0] sm:$0x1] }
  0x8a   :  { %32 = vst [vmem:[%s56_s1] sm:$0x1] %v30_v8 }

// kernel: vq_decoder2d_forward.2
= control target key start
LH: loop header
LB: loop body
LE: loop exit
PB: predicated region body
PF: predicated region fallthrough
CT: control target
= control target key end

     0   :  { %v2342_v5 = vmov 0   ;;  %vm342_vm0 = vcmask 588800   ;;  %vm439_vm1 = vcmask 1043456   ;;  %vm1054_vm2 = vcmask 1041408   ;;  %s3231_s1 = inlined_call_operand.vmem [shape: bf16[72,4], index: 1, kind: input, shape index: {}]   ;;  %s3232_s0 = inlined_call_operand.vmem [shape: bf16[512,72], index: 0, kind: input, shape index: {}]   ;;  %s3233_s2 = inlined_call_operand.vmem [shape: bf16[4,8], index: 2, kind: input, shape index: {}]   ;;  %s3234_s3 = inlined_call_operand.vmem [shape: bf16[512,8], index: 3, kind: input, shape index: {}]   ;;  %s3235_s4 = inlined_call_operand.vmem [shape: bf16[512,8], index: 4, kind: output, shape index: {}]  }
   0x1   :  { %v2337_v0 = vld [vmem:[%s3231_s1] sm:$0xff]   ;;  %v2338_v1 = vld [vmem:[%s3231_s1 + $0x8] sm:$0xff]   ;;  %v2339_v2 = vld [vmem:[%s3231_s1 + $0x10] sm:$0xff]   ;;  %vm957_vm3 = vcmask 31744   ;;  %vm1667_vm4 = vcmask 60416  }
   0x2   :  { %2194 = vmatprep.subr.bf16.mxu0 %v2337_v0  ;;  %v18_v3 = vld [vmem:[%s3232_s0] sm:$0xf]  ;;  %v19_v4 = vld [vmem:[%s3232_s0 + $0x4] sm:$0xf]  ;;  %v2340_v8 = vld [vmem:[%s3231_s1 + $0x18] sm:$0xff]  }
   0x3   :  { %2195 = vmatpush3.bf16.msra.mxu0 %v2337_v0  ;;  %v82_v6 = vmax.bf16 %v2342_v5, %v18_v3  ;;  %v83_v7 = vmax.bf16 %v2342_v5, %v19_v4  ;;  %v2341_v10 = vld [vmem:[%s3231_s1 + $0x20] ss:$0 sps:$4 sm:$0xff]   ;;  %v20_v11 = vld [vmem:[%s3232_s0 + $0x8] sm:$0xf]  ;;  %v21_v12 = vld [vmem:[%s3232_s0 + $0xc] sm:$0xf] }
   0x4   :  { %2196 = vmatprep.subr.bf16.mxu0 %v2338_v1  ;;  %v22_v13 = vld [vmem:[%s3232_s0 + $0x10] sm:$0xf]  ;;  %v23_v14 = vld [vmem:[%s3232_s0 + $0x14] sm:$0xf]  ;;  %v24_v15 = vld [vmem:[%s3232_s0 + $0x18] sm:$0xf]  ;;  %v84_v19 = vmax.bf16 %v2342_v5, %v20_v11  ;;  %v85_v20 = vmax.bf16 %v2342_v5, %v21_v12 }
   0x5   :  { %v1736_v9 = vcombine.low %v82_v6, %v83_v7  ;;  %v25_v16 = vld [vmem:[%s3232_s0 + $0x1c] sm:$0xf]  ;;  %v26_v17 = vld [vmem:[%s3232_s0 + $0x20] sm:$0xf]  ;;  %v27_v18 = vld [vmem:[%s3232_s0 + $0x24] sm:$0xf]  ;;  %v86_v22 = vmax.bf16 %v2342_v5, %v22_v13  ;;  %v87_v23 = vmax.bf16 %v2342_v5, %v23_v14  ;;  %v2422_v24 = vmax.bf16 %v2342_v5, %v24_v15 }
   0x6   :  { %v441_v21 = vsel %vm439_vm1, %v2341_v10, 0  ;;  %v2425_v25 = vmax.bf16 %v2342_v5, %v25_v16  ;;  %v2428_v26 = vmax.bf16 %v2342_v5, %v26_v17  ;;  %v2431_v27 = vmax.bf16 %v2342_v5, %v27_v18  ;;  %v48_v28 = vld [vmem:[%s3232_s0 + $0x78] sm:$0xf]  ;;  %v49_v29 = vld [vmem:[%s3232_s0 + $0x7c] sm:$0xf] }
   0x7   :  { %2197 = vmatpush3.bf16.msra.mxu0 %v2338_v1  ;;  %2204 = vmatprep.mubr.msk.bf16.mxu0 %vm342_vm0, %v1736_v9  ;;  %v50_v30 = vld [vmem:[%s3232_s0 + $0x80] sm:$0xf]  ;;  %v1737_v31 = vcombine.low %v84_v19, %v85_v20  ;;  %v51_v32 = vld [vmem:[%s3232_s0 + $0x84] sm:$0xf]  ;;  %v52_v33 = vld [vmem:[%s3232_s0 + $0x88] sm:$0xf]  ;;  %v1738_v35 = vcombine.low %v86_v22, %v87_v23  ;;  %v2453_v36 = vmax.bf16 %v2342_v5, %v48_v28 }
   0x8   :  { %2198 = vmatprep.subr.bf16.mxu0 %v2339_v2  ;;  %v53_v34 = vld [vmem:[%s3232_s0 + $0x8c] sm:$0xf]  ;;  %v2456_v37 = vmax.bf16 %v2342_v5, %v49_v29  ;;  %v2459_v38 = vmax.bf16 %v2342_v5, %v50_v30  ;;  %v54_v39 = vld [vmem:[%s3232_s0 + $0x90] sm:$0xf]  ;;  %v55_v40 = vld [vmem:[%s3232_s0 + $0x94] sm:$0xf]  ;;  %v1739_v42 = vcombine.low %v2422_v24, %v2425_v25  ;;  %v1740_v43 = vcombine.low %v2428_v26, %v2431_v27 }
   0x9   :  { %v56_v41 = vld [vmem:[%s3232_s0 + $0x98] sm:$0xf]  ;;  %v2475_v44 = vmax.bf16 %v2342_v5, %v51_v32  ;;  %v2478_v45 = vmax.bf16 %v2342_v5, %v52_v33  ;;  %v57_v46 = vld [vmem:[%s3232_s0 + $0x9c] sm:$0xf]  ;;  %v58_v47 = vld [vmem:[%s3232_s0 + $0xa0] sm:$0xf]  ;;  %v2492_v50 = vmax.bf16 %v2342_v5, %v53_v34  ;;  %v2495_v51 = vmax.bf16 %v2342_v5, %v54_v39 }
   0xa   :  { %v59_v48 = vld [vmem:[%s3232_s0 + $0xa4] sm:$0xf]  ;;  %v1751_v49 = vcombine.low %v2453_v36, %v2456_v37  ;;  %v2498_v52 = vmax.bf16 %v2342_v5, %v55_v40  ;;  %v60_v53 = vld [vmem:[%s3232_s0 + $0xa8] sm:$0xf]  ;;  %v61_v54 = vld [vmem:[%s3232_s0 + $0xac] sm:$0xf]  ;;  %v2512_v57 = vmax.bf16 %v2342_v5, %v56_v41  ;;  %v2515_v58 = vmax.bf16 %v2342_v5, %v57_v46 }
   0xb   :  { %2199 = vmatpush3.bf16.msra.mxu0 %v2339_v2  ;;  %v62_v55 = vld [vmem:[%s3232_s0 + $0xb0] sm:$0xf]  ;;  %v1752_v56 = vcombine.low %v2459_v38, %v2475_v44  ;;  %v2518_v59 = vmax.bf16 %v2342_v5, %v58_v47  ;;  %v63_v60 = vld [vmem:[%s3232_s0 + $0xb4] sm:$0xf]  ;;  %v64_v61 = vld [vmem:[%s3232_s0 + $0xb8] sm:$0xf]  ;;  %v1753_v63 = vcombine.low %v2478_v45, %v2492_v50  ;;  %v2534_v1 = vmax.bf16 %v2342_v5, %v59_v48 }
   0xc   :  { %2200 = vmatprep.subr.bf16.mxu0 %v2340_v8  ;;  %v65_v62 = vld [vmem:[%s3232_s0 + $0xbc] sm:$0xf]  ;;  %v1754_v0 = vcombine.low %v2495_v51, %v2498_v52  ;;  %v2537_v2 = vmax.bf16 %v2342_v5, %v60_v53  ;;  %v66_v3 = vld [vmem:[%s3232_s0 + $0xc0] sm:$0xf]  ;;  %v67_v4 = vld [vmem:[%s3232_s0 + $0xc4] sm:$0xf]  ;;  %v1755_v7 = vcombine.low %v2512_v57, %v2515_v58  ;;  %v2555_v9 = vmax.bf16 %v2342_v5, %v62_v55 }
   0xd   :  { %v68_v6 = vld [vmem:[%s3232_s0 + $0xc8] sm:$0xf]  ;;  %v69_v11 = vld [vmem:[%s3232_s0 + $0xcc] sm:$0xf]  ;;  %v70_v12 = vld [vmem:[%s3232_s0 + $0xd0] sm:$0xf]  ;;  %v1756_v14 = vcombine.low %v2518_v59, %v2534_v1  ;;  %v2573_v15 = vmax.bf16 %v2342_v5, %v64_v61  ;;  %v2576_v16 = vmax.bf16 %v2342_v5, %v65_v62  ;;  %v2579_v17 = vmax.bf16 %v2342_v5, %v66_v3 }
   0xe   :  { %v71_v13 = vld [vmem:[%s3232_s0 + $0xd4] sm:$0xf]  ;;  %v72_v18 = vld [vmem:[%s3232_s0 + $0xd8] sm:$0xf]  ;;  %v73_v19 = vld [vmem:[%s3232_s0 + $0xdc] sm:$0xf]  ;;  %v2595_v23 = vmax.bf16 %v2342_v5, %v67_v4  ;;  %v2598_v28 = vmax.bf16 %v2342_v5, %v68_v6  ;;  %v2609_v32 = vmax.bf16 %v2342_v5, %v69_v11  ;;  %v2612_v33 = vmax.bf16 %v2342_v5, %v70_v12 }
   0xf   :  { %2201 = vmatpush3.bf16.msra.mxu0 %v2340_v8  ;;  %v2552_v8 = vmax.bf16 %v2342_v5, %v61_v54  ;;  %v74_v20 = vld [vmem:[%s3232_s0 + $0xe0] sm:$0xf]  ;;  %v75_v29 = vld [vmem:[%s3232_s0 + $0xe4] sm:$0xf]  ;;  %v76_v30 = vld [vmem:[%s3232_s0 + $0xe8] sm:$0xf]  ;;  %v2615_v34 = vmax.bf16 %v2342_v5, %v71_v13  ;;  %v2629_v46 = vmax.bf16 %v2342_v5, %v72_v18  ;;  %v2632_v47 = vmax.bf16 %v2342_v5, %v73_v19 }
  0x10   :  { %2334 = vmatprep.subr.msk.bf16.mxu0 %vm439_vm1, %v2341_v10  ;;  %v2558_v10 = vmax.bf16 %v2342_v5, %v63_v60  ;;  %v78_v39 = vld [vmem:[%s3232_s0 + $0xf0] sm:$0xf]  ;;  %v79_v40 = vld [vmem:[%s3232_s0 + $0xf4] sm:$0xf]  ;;  %v1760_v41 = vcombine.low %v2579_v17, %v2595_v23  ;;  %v2635_v48 = vmax.bf16 %v2342_v5, %v74_v20  ;;  %v80_v53 = vld [vmem:[%s3232_s0 + $0xf8] sm:$0xf]  ;;  %v1761_v61 = vcombine.low %v2598_v28, %v2609_v32 }
  0x11   :  { %v81_v54 = vld [vmem:[%s3232_s0 + $0xfc] sm:$0xf]  ;;  %v28_v55 = vld [vmem:[%s3232_s0 + $0x28] sm:$0xf]  ;;  %v29_v60 = vld [vmem:[%s3232_s0 + $0x2c] sm:$0xf]  ;;  %v1762_v62 = vcombine.low %v2612_v33, %v2615_v34  ;;  %v2654_v3 = vmax.bf16 %v2342_v5, %v75_v29  ;;  %v2657_v4 = vmax.bf16 %v2342_v5, %v76_v30  ;;  %v1763_v12 = vcombine.low %v2629_v46, %v2632_v47 }
  0x12   :  { %v1758_v22 = vcombine.low %v2555_v9, %v2558_v10  ;;  %v30_v6 = vld [vmem:[%s3232_s0 + $0x30] sm:$0xf]  ;;  %v31_v11 = vld [vmem:[%s3232_s0 + $0x34] sm:$0xf]  ;;  %v2671_v18 = vmax.bf16 %v2342_v5, %v78_v39  ;;  %v2674_v19 = vmax.bf16 %v2342_v5, %v79_v40  ;;  %v2679_v29 = vmax.bf16 %v2342_v5, %v80_v53  ;;  %v34_v26 = vld [vmem:[%s3232_s0 + $0x40] sm:$0xf] }
  0x13   :  { %2203 = vmatpush3.bf16.msra.mxu0 %v441_v21  ;;  %v1757_v21 = vcombine.low %v2537_v2, %v2552_v8  ;;  %v2682_v30 = vmax.bf16 %v2342_v5, %v81_v54  ;;  %v93_v39 = vmax.bf16 %v2342_v5, %v29_v60  ;;  %v94_v53 = vmax.bf16 %v2342_v5, %v30_v6  ;;  %v33_v60 = vld [vmem:[%s3232_s0 + $0x3c] sm:$0xf]  ;;  %v35_v27 = vld [vmem:[%s3232_s0 + $0x44] sm:$0xf] }
  0x14   :  { %v1766_v20 = vcombine.low %v2671_v18, %v2674_v19  ;;  %v95_v24 = vmax.bf16 %v2342_v5, %v31_v11  ;;  %v97_v6 = vmax.bf16 %v2342_v5, %v33_v60  ;;  %v98_v11 = vmax.bf16 %v2342_v5, %v34_v26 }
  0x15   :  { %v1767_v25 = vcombine.low %v2679_v29, %v2682_v30  ;;  %v3236_v37 = vcombine.low %v2635_v48, %v2654_v3 }
  0x16   :  { %2205 = vmatmul.mubr.msk.bf16.vlgmr.msra.gmra.mrb[0].mxu0 %vm342_vm0, %v1737_v31  ;;  %v1759_v31 = vcombine.low %v2573_v15, %v2576_v16  ;;  %v1742_v54 = vcombine.low %v94_v53, %v95_v24  ;;  %v36_v24 = vld [vmem:[%s3232_s0 + $0x48] sm:$0xf] }
  0x17   :  { %2208 = vmatprep.mubr.msk.bf16.mxu0 %vm342_vm0, %v1738_v35  ;;  %v77_v35 = vld [vmem:[%s3232_s0 + $0xec] sm:$0xf]  ;;  %v100_v60 = vmax.bf16 %v2342_v5, %v36_v24  ;;  %v42_v24 = vld [vmem:[%s3232_s0 + $0x60] sm:$0xf] }
  0x18   :  { %v2668_v13 = vmax.bf16 %v2342_v5, %v77_v35  ;;  %v92_v35 = vmax.bf16 %v2342_v5, %v28_v55  ;;  %v32_v55 = vld [vmem:[%s3232_s0 + $0x38] sm:$0xf] }
  0x1a   :  { %v1765_v40 = vcombine.low %v2657_v4, %v2668_v13 }
  0x1e   :  { %2209 = vmatmul.mubr.msk.bf16.gmra.mrb[4].mxu0 %vm342_vm0, %v1739_v42  ;;  %v1741_v42 = vcombine.low %v92_v35, %v93_v39  ;;  %v99_v35 = vmax.bf16 %v2342_v5, %v35_v27 }
  0x1f   :  { %2212 = vmatprep.mubr.msk.bf16.mxu0 %vm342_vm0, %v1740_v43  ;;  %v96_v43 = vmax.bf16 %v2342_v5, %v32_v55  ;;  %v38_v55 = vld [vmem:[%s3232_s0 + $0x50] sm:$0xf] }
  0x20   :  { %v1744_v53 = vcombine.low %v98_v11, %v99_v35  ;;  %v102_v27 = vmax.bf16 %v2342_v5, %v38_v55  ;;  %v40_v35 = vld [vmem:[%s3232_s0 + $0x58] sm:$0xf] }
  0x21   :  { %v1743_v39 = vcombine.low %v96_v43, %v97_v6 }
  0x26   :  { %2213 = vmatmul.mubr.msk.bf16.gmra.mrb[8].mxu0 %vm342_vm0, %v1741_v42  ;;  %v37_v42 = vld [vmem:[%s3232_s0 + $0x4c] sm:$0xf] }
  0x27   :  { %2216 = vmatprep.mubr.msk.bf16.mxu0 %vm342_vm0, %v1742_v54  ;;  %v39_v54 = vld [vmem:[%s3232_s0 + $0x54] sm:$0xf]  ;;  %v101_v26 = vmax.bf16 %v2342_v5, %v37_v42  ;;  %v104_v42 = vmax.bf16 %v2342_v5, %v40_v35  ;;  %v46_v35 = vld [vmem:[%s3232_s0 + $0x70] sm:$0xf] }
  0x28   :  { %v103_v43 = vmax.bf16 %v2342_v5, %v39_v54  ;;  %v106_v54 = vmax.bf16 %v2342_v5, %v42_v24 }
  0x29   :  { %v1745_v6 = vcombine.low %v100_v60, %v101_v26 }
  0x2a   :  { %v1746_v11 = vcombine.low %v102_v27, %v103_v43  ;;  %v44_v43 = vld [vmem:[%s3232_s0 + $0x68] sm:$0xf] }
  0x2e   :  { %2217 = vmatmul.mubr.msk.bf16.gmra.mrb[12].mxu0 %vm342_vm0, %v1743_v39  ;;  %v41_v39 = vld [vmem:[%s3232_s0 + $0x5c] sm:$0xf] }
  0x2f   :  { %2220 = vmatprep.mubr.msk.bf16.mxu0 %vm342_vm0, %v1744_v53  ;;  %v43_v53 = vld [vmem:[%s3232_s0 + $0x64] sm:$0xf]  ;;  %v105_v55 = vmax.bf16 %v2342_v5, %v41_v39  ;;  %v108_v39 = vmax.bf16 %v2342_v5, %v44_v43 }
  0x30   :  { %v107_v60 = vmax.bf16 %v2342_v5, %v43_v53  ;;  %v110_v53 = vmax.bf16 %v2342_v5, %v46_v35 }
  0x31   :  { %v1747_v26 = vcombine.low %v104_v42, %v105_v55 }
  0x32   :  { %v1748_v27 = vcombine.low %v106_v54, %v107_v60 }
  0x36   :  { %2221 = vmatmul.mubr.msk.bf16.gmra.mrb[16].mxu0 %vm342_vm0, %v1745_v6  ;;  %v45_v6 = vld [vmem:[%s3232_s0 + $0x6c] sm:$0xf] }
  0x37   :  { %2224 = vmatprep.mubr.msk.bf16.mxu0 %vm342_vm0, %v1746_v11  ;;  %v47_v11 = vld [vmem:[%s3232_s0 + $0x74] sm:$0xf]  ;;  %v109_v24 = vmax.bf16 %v2342_v5, %v45_v6 }
  0x38   :  { %v111_v42 = vmax.bf16 %v2342_v5, %v47_v11  ;;  %v828_v5 = vld [vmem:[%s3233_s2] sm:$0x3] }
  0x39   :  { %v1749_v55 = vcombine.low %v108_v39, %v109_v24  ;;  %2335 = vmatprep.subr.msk.bf16.mxu1 %vm1054_vm2, %v828_v5  ;;  %v1056_v36 = vsel %vm1054_vm2, %v828_v5, 0 }
  0x3a   :  { %v1750_v54 = vcombine.low %v110_v53, %v111_v42  ;;  %2269 = vmatpush3.bf16.msra.mxu1 %v1056_v36 }
  0x3e   :  { %2225 = vmatmul.mubr.msk.bf16.gmra.mrb[20].mxu0 %vm342_vm0, %v1747_v26 }
  0x3f   :  { %2228 = vmatprep.mubr.msk.bf16.mxu0 %vm342_vm0, %v1748_v27 }
  0x46   :  { %2229 = vmatmul.mubr.msk.bf16.gmra.mrb[24].mxu0 %vm342_vm0, %v1749_v55 }
  0x47   :  { %2232 = vmatprep.mubr.msk.bf16.mxu0 %vm342_vm0, %v1750_v54 }
  0x4e   :  { %2233 = vmatmul.mubr.msk.bf16.gmra.mrb[28].mxu0 %vm342_vm0, %v1751_v49 }
  0x4f   :  { %2236 = vmatprep.mubr.msk.bf16.mxu0 %vm342_vm0, %v1752_v56 }
  0x56   :  { %2237 = vmatmul.mubr.msk.bf16.gmra.mrb[32].mxu0 %vm342_vm0, %v1753_v63 }
  0x57   :  { %2240 = vmatprep.mubr.msk.bf16.mxu0 %vm342_vm0, %v1754_v0 }
  0x5e   :  { %2241 = vmatmul.mubr.msk.bf16.gmra.mrb[36].mxu0 %vm342_vm0, %v1755_v7 }
  0x5f   :  { %2244 = vmatprep.mubr.msk.bf16.mxu0 %vm342_vm0, %v1756_v14 }
  0x66   :  { %2245 = vmatmul.mubr.msk.bf16.gmra.mrb[40].mxu0 %vm342_vm0, %v1757_v21 }
  0x67   :  { %2248 = vmatprep.mubr.msk.bf16.mxu0 %vm342_vm0, %v1758_v22 }
  0x6e   :  { %2249 = vmatmul.mubr.msk.bf16.gmra.mrb[44].mxu0 %vm342_vm0, %v1759_v31 }
  0x6f   :  { %2252 = vmatprep.mubr.msk.bf16.mxu0 %vm342_vm0, %v1760_v41 }
  0x76   :  { %2253 = vmatmul.mubr.msk.bf16.gmra.mrb[48].mxu0 %vm342_vm0, %v1761_v61 }
  0x77   :  { %2256 = vmatprep.mubr.msk.bf16.mxu0 %vm342_vm0, %v1762_v62 }
  0x7e   :  { %2257 = vmatmul.mubr.msk.bf16.gmra.mrb[52].mxu0 %vm342_vm0, %v1763_v12 }
  0x7f   :  { %2260 = vmatprep.mubr.msk.bf16.mxu0 %vm342_vm0, %v3236_v37 }
  0x86   :  { %2261 = vmatmul.mubr.msk.bf16.gmra.mrb[56].mxu0 %vm342_vm0, %v1765_v40 }
  0x87   :  { %2264 = vmatprep.mubr.msk.bf16.mxu0 %vm342_vm0, %v1766_v20 }
  0x8e   :  { %2265 = vmatmul.mubr.msk.bf16.gmra.mrb[60].mxu0 %vm342_vm0, %v1767_v25 }
  0xe9   :  { %v2206_v38 = vpop.f32.mrb[0].mxu0 }
  0xea   :  { %v477_v44 = vpop.f32.mrb[1].mxu0  ;;  %v734_v49 = vmax.f32 %v2206_v38, 0.0 }
  0xeb   :  { %v2207_v45 = vpop.f32.mrb[2].mxu0  ;;  %v732_v52 = vmax.f32 %v477_v44, 0.0 }
  0xec   :  { %v735_v50 = vmax.f32 %v2207_v45, 0.0  ;;  %v480_v51 = vpop.f32.mrb[3].mxu0 }
  0xed   :  { %v733_v56 = vmax.f32 %v480_v51, 0.0 }
  0xee   :  { %v797_v57 = vpack.c.bf16 %v735_v50, %v734_v49 }
  0xef   :  { %v796_v58 = vpack.c.bf16 %v733_v56, %v732_v52 }
  0xf1   :  { %v2210_v59 = vpop.f32.mrb[4].mxu0  ;;  %2270 = vmatprep.mubr.msk.bf16.mxu1 %vm957_vm3, %v796_v58 }
  0xf2   :  { %v493_v63 = vpop.f32.mrb[5].mxu0  ;;  %2271 = vmatmul.mubr.msk.bf16.vlgmr.msra.gmra.mrb[0].mxu1 %vm957_vm3, %v797_v57  ;;  %v738_v1 = vmax.f32 %v2210_v59, 0.0 }
  0xf3   :  { %v2211_v0 = vpop.f32.mrb[6].mxu0  ;;  %v736_v8 = vmax.f32 %v493_v63, 0.0 }
  0xf4   :  { %v739_v2 = vmax.f32 %v2211_v0, 0.0  ;;  %v496_v7 = vpop.f32.mrb[7].mxu0 }
  0xf5   :  { %v737_v9 = vmax.f32 %v496_v7, 0.0 }
  0xf6   :  { %v799_v10 = vpack.c.bf16 %v739_v2, %v738_v1 }
  0xf7   :  { %v798_v14 = vpack.c.bf16 %v737_v9, %v736_v8 }
  0xf9   :  { %v2214_v15 = vpop.f32.mrb[8].mxu0  ;;  %2274 = vmatprep.mubr.msk.bf16.mxu1 %vm957_vm3, %v798_v14 }
  0xfa   :  { %v509_v16 = vpop.f32.mrb[9].mxu0  ;;  %2275 = vmatmul.mubr.msk.bf16.gmra.mrb[4].mxu1 %vm957_vm3, %v799_v10  ;;  %v742_v21 = vmax.f32 %v2214_v15, 0.0 }
  0xfb   :  { %v2215_v17 = vpop.f32.mrb[10].mxu0  ;;  %v740_v28 = vmax.f32 %v509_v16, 0.0 }
  0xfc   :  { %v743_v22 = vmax.f32 %v2215_v17, 0.0  ;;  %v512_v23 = vpop.f32.mrb[11].mxu0 }
  0xfd   :  { %v741_v31 = vmax.f32 %v512_v23, 0.0 }
  0xfe   :  { %v801_v32 = vpack.c.bf16 %v743_v22, %v742_v21 }
  0xff   :  { %v800_v33 = vpack.c.bf16 %v741_v31, %v740_v28 }
 0x101   :  { %v2218_v34 = vpop.f32.mrb[12].mxu0  ;;  %2278 = vmatprep.mubr.msk.bf16.mxu1 %vm957_vm3, %v800_v33 }
 0x102   :  { %v525_v41 = vpop.f32.mrb[13].mxu0  ;;  %2279 = vmatmul.mubr.msk.bf16.gmra.mrb[8].mxu1 %vm957_vm3, %v801_v32  ;;  %v746_v47 = vmax.f32 %v2218_v34, 0.0 }
 0x103   :  { %v2219_v46 = vpop.f32.mrb[14].mxu0  ;;  %v744_v62 = vmax.f32 %v525_v41, 0.0 }
 0x104   :  { %v747_v48 = vmax.f32 %v2219_v46, 0.0  ;;  %v528_v61 = vpop.f32.mrb[15].mxu0 }
 0x105   :  { %v745_v3 = vmax.f32 %v528_v61, 0.0 }
 0x106   :  { %v803_v4 = vpack.c.bf16 %v747_v48, %v746_v47 }
 0x107   :  { %v802_v12 = vpack.c.bf16 %v745_v3, %v744_v62 }
 0x109   :  { %v2222_v13 = vpop.f32.mrb[16].mxu0  ;;  %2282 = vmatprep.mubr.msk.bf16.mxu1 %vm957_vm3, %v802_v12 }
 0x10a   :  { %v541_v18 = vpop.f32.mrb[17].mxu0  ;;  %2283 = vmatmul.mubr.msk.bf16.gmra.mrb[12].mxu1 %vm957_vm3, %v803_v4  ;;  %v750_v20 = vmax.f32 %v2222_v13, 0.0 }
 0x10b   :  { %v2223_v19 = vpop.f32.mrb[18].mxu0  ;;  %v748_v40 = vmax.f32 %v541_v18, 0.0 }
 0x10c   :  { %v751_v29 = vmax.f32 %v2223_v19, 0.0  ;;  %v544_v30 = vpop.f32.mrb[19].mxu0 }
 0x10d   :  { %v749_v25 = vmax.f32 %v544_v30, 0.0 }
 0x10e   :  { %v805_v60 = vpack.c.bf16 %v751_v29, %v750_v20 }
 0x10f   :  { %v804_v26 = vpack.c.bf16 %v749_v25, %v748_v40 }
 0x111   :  { %v2226_v27 = vpop.f32.mrb[20].mxu0  ;;  %2286 = vmatprep.mubr.msk.bf16.mxu1 %vm957_vm3, %v804_v26 }
 0x112   :  { %v557_v43 = vpop.f32.mrb[21].mxu0  ;;  %2287 = vmatmul.mubr.msk.bf16.gmra.mrb[16].mxu1 %vm957_vm3, %v805_v60  ;;  %v754_v35 = vmax.f32 %v2226_v27, 0.0 }
 0x113   :  { %v2227_v6 = vpop.f32.mrb[22].mxu0  ;;  %v752_v24 = vmax.f32 %v557_v43, 0.0 }
 0x114   :  { %v755_v11 = vmax.f32 %v2227_v6, 0.0  ;;  %v560_v39 = vpop.f32.mrb[23].mxu0 }
 0x115   :  { %v753_v53 = vmax.f32 %v560_v39, 0.0 }
 0x116   :  { %v807_v42 = vpack.c.bf16 %v755_v11, %v754_v35 }
 0x117   :  { %v806_v55 = vpack.c.bf16 %v753_v53, %v752_v24 }
 0x119   :  { %v2230_v54 = vpop.f32.mrb[24].mxu0  ;;  %2290 = vmatprep.mubr.msk.bf16.mxu1 %vm957_vm3, %v806_v55 }
 0x11a   :  { %v573_v5 = vpop.f32.mrb[25].mxu0  ;;  %2291 = vmatmul.mubr.msk.bf16.gmra.mrb[20].mxu1 %vm957_vm3, %v807_v42  ;;  %v758_v37 = vmax.f32 %v2230_v54, 0.0 }
 0x11b   :  { %v2231_v36 = vpop.f32.mrb[26].mxu0  ;;  %v756_v45 = vmax.f32 %v573_v5, 0.0 }
 0x11c   :  { %v759_v38 = vmax.f32 %v2231_v36, 0.0  ;;  %v576_v44 = vpop.f32.mrb[27].mxu0 }
 0x11d   :  { %v757_v49 = vmax.f32 %v576_v44, 0.0 }
 0x11e   :  { %v809_v50 = vpack.c.bf16 %v759_v38, %v758_v37 }
 0x11f   :  { %v808_v51 = vpack.c.bf16 %v757_v49, %v756_v45 }
 0x121   :  { %v2234_v52 = vpop.f32.mrb[28].mxu0  ;;  %2294 = vmatprep.mubr.msk.bf16.mxu1 %vm957_vm3, %v808_v51 }
 0x122   :  { %v589_v56 = vpop.f32.mrb[29].mxu0  ;;  %2295 = vmatmul.mubr.msk.bf16.gmra.mrb[24].mxu1 %vm957_vm3, %v809_v50  ;;  %v762_v58 = vmax.f32 %v2234_v52, 0.0 }
 0x123   :  { %v2235_v57 = vpop.f32.mrb[30].mxu0  ;;  %v760_v0 = vmax.f32 %v589_v56, 0.0 }
 0x124   :  { %v763_v59 = vmax.f32 %v2235_v57, 0.0  ;;  %v592_v63 = vpop.f32.mrb[31].mxu0 }
 0x125   :  { %v761_v1 = vmax.f32 %v592_v63, 0.0 }
 0x126   :  { %v811_v2 = vpack.c.bf16 %v763_v59, %v762_v58 }
 0x127   :  { %v810_v7 = vpack.c.bf16 %v761_v1, %v760_v0 }
 0x129   :  { %v2238_v8 = vpop.f32.mrb[32].mxu0  ;;  %2298 = vmatprep.mubr.msk.bf16.mxu1 %vm957_vm3, %v810_v7 }
 0x12a   :  { %v605_v9 = vpop.f32.mrb[33].mxu0  ;;  %2299 = vmatmul.mubr.msk.bf16.gmra.mrb[28].mxu1 %vm957_vm3, %v811_v2  ;;  %v766_v14 = vmax.f32 %v2238_v8, 0.0 }
 0x12b   :  { %v2239_v10 = vpop.f32.mrb[34].mxu0  ;;  %v764_v17 = vmax.f32 %v605_v9, 0.0 }
 0x12c   :  { %v767_v15 = vmax.f32 %v2239_v10, 0.0  ;;  %v608_v16 = vpop.f32.mrb[35].mxu0 }
 0x12d   :  { %v765_v21 = vmax.f32 %v608_v16, 0.0 }
 0x12e   :  { %v813_v22 = vpack.c.bf16 %v767_v15, %v766_v14 }
 0x12f   :  { %v812_v23 = vpack.c.bf16 %v765_v21, %v764_v17 }
 0x131   :  { %v2242_v28 = vpop.f32.mrb[36].mxu0  ;;  %2302 = vmatprep.mubr.msk.bf16.mxu1 %vm957_vm3, %v812_v23 }
 0x132   :  { %v621_v31 = vpop.f32.mrb[37].mxu0  ;;  %2303 = vmatmul.mubr.msk.bf16.gmra.mrb[32].mxu1 %vm957_vm3, %v813_v22  ;;  %v770_v33 = vmax.f32 %v2242_v28, 0.0 }
 0x133   :  { %v2243_v32 = vpop.f32.mrb[38].mxu0  ;;  %v768_v46 = vmax.f32 %v621_v31, 0.0 }
 0x134   :  { %v771_v34 = vmax.f32 %v2243_v32, 0.0  ;;  %v624_v41 = vpop.f32.mrb[39].mxu0 }
 0x135   :  { %v769_v47 = vmax.f32 %v624_v41, 0.0 }
 0x136   :  { %v815_v48 = vpack.c.bf16 %v771_v34, %v770_v33 }
 0x137   :  { %v814_v61 = vpack.c.bf16 %v769_v47, %v768_v46  ;;  %v2093_v46 = vld [vmem:[%s3234_s3 + $0x8] sm:$0xff]   ;;  %v1966_v47 = vld [vmem:[%s3234_s3] sm:$0xff]  }
 0x139   :  { %v2246_v62 = vpop.f32.mrb[40].mxu0  ;;  %2306 = vmatprep.mubr.msk.bf16.mxu1 %vm957_vm3, %v814_v61  ;;  %v1967_v61 = vunpack.c.l.bf16 %v1966_v47 }
 0x13a   :  { %v637_v3 = vpop.f32.mrb[41].mxu0  ;;  %2307 = vmatmul.mubr.msk.bf16.gmra.mrb[36].mxu1 %vm957_vm3, %v815_v48  ;;  %v774_v12 = vmax.f32 %v2246_v62, 0.0  ;;  %v1971_v48 = vunpack.c.l.bf16 %v2093_v46  ;;  %v1972_v62 = vunpack.c.h.bf16 %v2093_v46 }
 0x13b   :  { %v2247_v4 = vpop.f32.mrb[42].mxu0  ;;  %v772_v19 = vmax.f32 %v637_v3, 0.0 }
 0x13c   :  { %v775_v13 = vmax.f32 %v2247_v4, 0.0  ;;  %v640_v18 = vpop.f32.mrb[43].mxu0  ;;  %v1968_v4 = vunpack.c.h.bf16 %v1966_v47 }
 0x13d   :  { %v773_v20 = vmax.f32 %v640_v18, 0.0 }
 0x13e   :  { %v817_v29 = vpack.c.bf16 %v775_v13, %v774_v12 }
 0x13f   :  { %v816_v30 = vpack.c.bf16 %v773_v20, %v772_v19  ;;  %v2095_v20 = vld [vmem:[%s3234_s3 + $0x18] sm:$0xff]  }
 0x141   :  { %v2250_v40 = vpop.f32.mrb[44].mxu0  ;;  %2310 = vmatprep.mubr.msk.bf16.mxu1 %vm957_vm3, %v816_v30 }
 0x142   :  { %v653_v25 = vpop.f32.mrb[45].mxu0  ;;  %2311 = vmatmul.mubr.msk.bf16.gmra.mrb[40].mxu1 %vm957_vm3, %v817_v29  ;;  %v778_v26 = vmax.f32 %v2250_v40, 0.0 }
 0x143   :  { %v2251_v60 = vpop.f32.mrb[46].mxu0  ;;  %v776_v6 = vmax.f32 %v653_v25, 0.0  ;;  %v2094_v25 = vld [vmem:[%s3234_s3 + $0x10] sm:$0xff]  }
 0x144   :  { %v779_v27 = vmax.f32 %v2251_v60, 0.0  ;;  %v656_v43 = vpop.f32.mrb[47].mxu0 }
 0x145   :  { %v777_v35 = vmax.f32 %v656_v43, 0.0 }
 0x146   :  { %v819_v11 = vpack.c.bf16 %v779_v27, %v778_v26 }
 0x147   :  { %v818_v39 = vpack.c.bf16 %v777_v35, %v776_v6  ;;  %v1979_v6 = vunpack.c.l.bf16 %v2095_v20 }
 0x149   :  { %v2254_v24 = vpop.f32.mrb[48].mxu0  ;;  %2314 = vmatprep.mubr.msk.bf16.mxu1 %vm957_vm3, %v818_v39  ;;  %v1975_v39 = vunpack.c.l.bf16 %v2094_v25 }
 0x14a   :  { %v669_v53 = vpop.f32.mrb[49].mxu0  ;;  %2315 = vmatmul.mubr.msk.bf16.gmra.mrb[44].mxu1 %vm957_vm3, %v819_v11  ;;  %v782_v55 = vmax.f32 %v2254_v24, 0.0 }
 0x14b   :  { %v2255_v42 = vpop.f32.mrb[50].mxu0  ;;  %v780_v36 = vmax.f32 %v669_v53, 0.0  ;;  %v1980_v53 = vunpack.c.h.bf16 %v2095_v20 }
 0x14c   :  { %v783_v54 = vmax.f32 %v2255_v42, 0.0  ;;  %v672_v5 = vpop.f32.mrb[51].mxu0 }
 0x14d   :  { %v781_v37 = vmax.f32 %v672_v5, 0.0 }
 0x14e   :  { %v821_v38 = vpack.c.bf16 %v783_v54, %v782_v55  ;;  %v1976_v54 = vunpack.c.h.bf16 %v2094_v25 }
 0x14f   :  { %v820_v44 = vpack.c.bf16 %v781_v37, %v780_v36 }
 0x151   :  { %v2258_v45 = vpop.f32.mrb[52].mxu0  ;;  %2318 = vmatprep.mubr.msk.bf16.mxu1 %vm957_vm3, %v820_v44  ;;  %v2097_v44 = vld [vmem:[%s3234_s3 + $0x28] sm:$0xff]  }
 0x152   :  { %v685_v49 = vpop.f32.mrb[53].mxu0  ;;  %2319 = vmatmul.mubr.msk.bf16.gmra.mrb[48].mxu1 %vm957_vm3, %v821_v38  ;;  %v786_v51 = vmax.f32 %v2258_v45, 0.0 }
 0x153   :  { %v2259_v50 = vpop.f32.mrb[54].mxu0  ;;  %v784_v57 = vmax.f32 %v685_v49, 0.0 }
 0x154   :  { %v787_v52 = vmax.f32 %v2259_v50, 0.0  ;;  %v688_v56 = vpop.f32.mrb[55].mxu0 }
 0x155   :  { %v785_v58 = vmax.f32 %v688_v56, 0.0 }
 0x156   :  { %v823_v59 = vpack.c.bf16 %v787_v52, %v786_v51  ;;  %v2096_v51 = vld [vmem:[%s3234_s3 + $0x20] sm:$0xff]  }
 0x157   :  { %v822_v63 = vpack.c.bf16 %v785_v58, %v784_v57 }
 0x159   :  { %v2262_v0 = vpop.f32.mrb[56].mxu0  ;;  %2322 = vmatprep.mubr.msk.bf16.mxu1 %vm957_vm3, %v822_v63 }
 0x15a   :  { %v701_v1 = vpop.f32.mrb[57].mxu0  ;;  %2323 = vmatmul.mubr.msk.bf16.gmra.mrb[52].mxu1 %vm957_vm3, %v823_v59  ;;  %v790_v7 = vmax.f32 %v2262_v0, 0.0  ;;  %v1987_v59 = vunpack.c.l.bf16 %v2097_v44 }
 0x15b   :  { %v2263_v2 = vpop.f32.mrb[58].mxu0  ;;  %v788_v10 = vmax.f32 %v701_v1, 0.0  ;;  %v1983_v1 = vunpack.c.l.bf16 %v2096_v51 }
 0x15c   :  { %v791_v8 = vmax.f32 %v2263_v2, 0.0  ;;  %v704_v9 = vpop.f32.mrb[59].mxu0 }
 0x15d   :  { %v789_v14 = vmax.f32 %v704_v9, 0.0 }
 0x15e   :  { %v825_v15 = vpack.c.bf16 %v791_v8, %v790_v7  ;;  %v1988_v7 = vunpack.c.h.bf16 %v2097_v44 }
 0x15f   :  { %v824_v16 = vpack.c.bf16 %v789_v14, %v788_v10  ;;  %v1984_v10 = vunpack.c.h.bf16 %v2096_v51 }
 0x161   :  { %v2266_v17 = vpop.f32.mrb[60].mxu0  ;;  %2326 = vmatprep.mubr.msk.bf16.mxu1 %vm957_vm3, %v824_v16 }
 0x162   :  { %v717_v21 = vpop.f32.mrb[61].mxu0  ;;  %2327 = vmatmul.mubr.msk.bf16.gmra.mrb[56].mxu1 %vm957_vm3, %v825_v15  ;;  %v794_v23 = vmax.f32 %v2266_v17, 0.0 }
 0x163   :  { %v2267_v22 = vpop.f32.mrb[62].mxu0  ;;  %v792_v32 = vmax.f32 %v717_v21, 0.0  ;;  %v2099_v21 = vld [vmem:[%s3234_s3 + $0x38] sm:$0xff]  }
 0x164   :  { %v795_v28 = vmax.f32 %v2267_v22, 0.0  ;;  %v720_v31 = vpop.f32.mrb[63].mxu0  ;;  %v1995_v46 = vunpack.c.l.bf16 %v2099_v21 }
 0x165   :  { %v793_v33 = vmax.f32 %v720_v31, 0.0  ;;  %v2098_v31 = vld [vmem:[%s3234_s3 + $0x30] sm:$0xff]  }
 0x166   :  { %v827_v34 = vpack.c.bf16 %v795_v28, %v794_v23 }
 0x167   :  { %v826_v41 = vpack.c.bf16 %v793_v33, %v792_v32 }
 0x169   :  { %2330 = vmatprep.mubr.msk.bf16.mxu1 %vm957_vm3, %v826_v41 }
 0x16a   :  { %2331 = vmatmul.mubr.msk.bf16.gmra.mrb[60].mxu1 %vm957_vm3, %v827_v34 }
 0x1c5   :  { %v2272_v3 = vpop.f32.mrb[0].mxu1 }
 0x1c6   :  { %v1101_v12 = vadd.f32 %v2272_v3, %v1971_v48  ;;  %v1092_v13 = vpop.f32.mrb[1].mxu1  ;;  %v1996_v3 = vunpack.c.h.bf16 %v2099_v21 }
 0x1c7   :  { %v1093_v18 = vadd.f32 %v1967_v61, %v1092_v13  ;;  %v2273_v19 = vpop.f32.mrb[2].mxu1  ;;  %v1991_v61 = vunpack.c.l.bf16 %v2098_v31  ;;  %v1992_v13 = vunpack.c.h.bf16 %v2098_v31 }
 0x1c8   :  { %v1349_v29 = vmax.f32 %v1101_v12, 0.0  ;;  %v1104_v30 = vadd.f32 %v2273_v19, %v1972_v62  ;;  %v1095_v40 = vpop.f32.mrb[3].mxu1 }
 0x1c9   :  { %v1347_v60 = vmax.f32 %v1093_v18, 0.0  ;;  %v1096_v26 = vadd.f32 %v1968_v4, %v1095_v40 }
 0x1ca   :  { %v1903_v27 = vpack.c.bf16 %v1349_v29, %v1349_v29  ;;  %v1350_v43 = vmax.f32 %v1104_v30, 0.0  ;;  %v2101_v30 = vld [vmem:[%s3234_s3 + $0x48] sm:$0xff]  }
 0x1cb   :  { %v1901_v35 = vpack.c.bf16 %v1347_v60, %v1347_v60  ;;  %v1348_v11 = vmax.f32 %v1096_v26, 0.0  ;;  %v2100_v26 = vld [vmem:[%s3234_s3 + $0x40] sm:$0xff]  }
 0x1cc   :  { %1670 = vst.msk [vmem:[%s3235_s4 + $0x8] sm:$0xf] %vm1667_vm4, %v1903_v27  ;;  %v1904_v24 = vpack.c.bf16 %v1350_v43, %v1350_v43 }
 0x1cd   :  { %1668 = vst.msk [vmem:[%s3235_s4] sm:$0xf] %vm1667_vm4, %v1901_v35  ;;  %v1902_v42 = vpack.c.bf16 %v1348_v11, %v1348_v11  ;;  %v2276_v55 = vpop.f32.mrb[4].mxu1  ;;  %v2003_v11 = vunpack.c.l.bf16 %v2101_v30 }
 0x1ce   :  { %1671 = vst.msk [vmem:[%s3235_s4 + $0xc] sm:$0xf] %vm1667_vm4, %v1904_v24  ;;  %v1117_v5 = vadd.f32 %v2276_v55, %v1979_v6  ;;  %v1108_v36 = vpop.f32.mrb[5].mxu1  ;;  %v2004_v55 = vunpack.c.h.bf16 %v2101_v30 }
 0x1cf   :  { %1669 = vst.msk [vmem:[%s3235_s4 + $0x4] sm:$0xf] %vm1667_vm4, %v1902_v42  ;;  %v1109_v37 = vadd.f32 %v1975_v39, %v1108_v36  ;;  %v2277_v38 = vpop.f32.mrb[6].mxu1  ;;  %v2000_v36 = vunpack.c.h.bf16 %v2100_v26 }
 0x1d0   :  { %v1353_v45 = vmax.f32 %v1117_v5, 0.0  ;;  %v1120_v49 = vadd.f32 %v2277_v38, %v1980_v53  ;;  %v1111_v50 = vpop.f32.mrb[7].mxu1  ;;  %v1999_v53 = vunpack.c.l.bf16 %v2100_v26 }
 0x1d1   :  { %v1351_v52 = vmax.f32 %v1109_v37, 0.0  ;;  %v1112_v56 = vadd.f32 %v1976_v54, %v1111_v50 }
 0x1d2   :  { %v1907_v57 = vpack.c.bf16 %v1353_v45, %v1353_v45  ;;  %v1354_v58 = vmax.f32 %v1120_v49, 0.0  ;;  %v2103_v49 = vld [vmem:[%s3234_s3 + $0x58] sm:$0xff]  }
 0x1d3   :  { %v1905_v63 = vpack.c.bf16 %v1351_v52, %v1351_v52  ;;  %v1352_v0 = vmax.f32 %v1112_v56, 0.0  ;;  %v2102_v56 = vld [vmem:[%s3234_s3 + $0x50] sm:$0xff]  }
 0x1d4   :  { %1674 = vst.msk [vmem:[%s3235_s4 + $0x18] sm:$0xf] %vm1667_vm4, %v1907_v57  ;;  %v1908_v2 = vpack.c.bf16 %v1354_v58, %v1354_v58 }
 0x1d5   :  { %1672 = vst.msk [vmem:[%s3235_s4 + $0x10] sm:$0xf] %vm1667_vm4, %v1905_v63  ;;  %v1906_v8 = vpack.c.bf16 %v1352_v0, %v1352_v0  ;;  %v2280_v9 = vpop.f32.mrb[8].mxu1  ;;  %v2011_v0 = vunpack.c.l.bf16 %v2103_v49 }
 0x1d6   :  { %1675 = vst.msk [vmem:[%s3235_s4 + $0x1c] sm:$0xf] %vm1667_vm4, %v1908_v2  ;;  %v1133_v14 = vadd.f32 %v2280_v9, %v1987_v59  ;;  %v1124_v15 = vpop.f32.mrb[9].mxu1  ;;  %v2012_v9 = vunpack.c.h.bf16 %v2103_v49 }
 0x1d7   :  { %1673 = vst.msk [vmem:[%s3235_s4 + $0x14] sm:$0xf] %vm1667_vm4, %v1906_v8  ;;  %v1125_v16 = vadd.f32 %v1983_v1, %v1124_v15  ;;  %v2281_v17 = vpop.f32.mrb[10].mxu1  ;;  %v2008_v15 = vunpack.c.h.bf16 %v2102_v56 }
 0x1d8   :  { %v1357_v22 = vmax.f32 %v1133_v14, 0.0  ;;  %v1136_v23 = vadd.f32 %v2281_v17, %v1988_v7  ;;  %v1127_v28 = vpop.f32.mrb[11].mxu1  ;;  %v2007_v7 = vunpack.c.l.bf16 %v2102_v56 }
 0x1d9   :  { %v1355_v32 = vmax.f32 %v1125_v16, 0.0  ;;  %v1128_v33 = vadd.f32 %v1984_v10, %v1127_v28 }
 0x1da   :  { %v1911_v34 = vpack.c.bf16 %v1357_v22, %v1357_v22  ;;  %v1358_v41 = vmax.f32 %v1136_v23, 0.0  ;;  %v2105_v23 = vld [vmem:[%s3234_s3 + $0x68] sm:$0xff]  }
 0x1db   :  { %v1909_v47 = vpack.c.bf16 %v1355_v32, %v1355_v32  ;;  %v1356_v48 = vmax.f32 %v1128_v33, 0.0  ;;  %v2104_v33 = vld [vmem:[%s3234_s3 + $0x60] sm:$0xff]  }
 0x1dc   :  { %1678 = vst.msk [vmem:[%s3235_s4 + $0x28] sm:$0xf] %vm1667_vm4, %v1911_v34  ;;  %v1912_v62 = vpack.c.bf16 %v1358_v41, %v1358_v41 }
 0x1dd   :  { %1676 = vst.msk [vmem:[%s3235_s4 + $0x20] sm:$0xf] %vm1667_vm4, %v1909_v47  ;;  %v1910_v4 = vpack.c.bf16 %v1356_v48, %v1356_v48  ;;  %v2284_v12 = vpop.f32.mrb[12].mxu1  ;;  %v2019_v48 = vunpack.c.l.bf16 %v2105_v23 }
 0x1de   :  { %1679 = vst.msk [vmem:[%s3235_s4 + $0x2c] sm:$0xf] %vm1667_vm4, %v1912_v62  ;;  %v1149_v18 = vadd.f32 %v2284_v12, %v1995_v46  ;;  %v1140_v19 = vpop.f32.mrb[13].mxu1  ;;  %v2020_v12 = vunpack.c.h.bf16 %v2105_v23 }
 0x1df   :  { %1677 = vst.msk [vmem:[%s3235_s4 + $0x24] sm:$0xf] %vm1667_vm4, %v1910_v4  ;;  %v1141_v20 = vadd.f32 %v1991_v61, %v1140_v19  ;;  %v2285_v29 = vpop.f32.mrb[14].mxu1  ;;  %v2016_v19 = vunpack.c.h.bf16 %v2104_v33 }
 0x1e0   :  { %v1361_v40 = vmax.f32 %v1149_v18, 0.0  ;;  %v1152_v25 = vadd.f32 %v2285_v29, %v1996_v3  ;;  %v1143_v60 = vpop.f32.mrb[15].mxu1  ;;  %v2015_v3 = vunpack.c.l.bf16 %v2104_v33 }
 0x1e1   :  { %v1359_v27 = vmax.f32 %v1141_v20, 0.0  ;;  %v1144_v43 = vadd.f32 %v1992_v13, %v1143_v60 }
 0x1e2   :  { %v1915_v6 = vpack.c.bf16 %v1361_v40, %v1361_v40  ;;  %v1362_v35 = vmax.f32 %v1152_v25, 0.0  ;;  %v2107_v25 = vld [vmem:[%s3234_s3 + $0x78] sm:$0xff]  }
 0x1e3   :  { %v1913_v39 = vpack.c.bf16 %v1359_v27, %v1359_v27  ;;  %v1360_v24 = vmax.f32 %v1144_v43, 0.0  ;;  %v2106_v43 = vld [vmem:[%s3234_s3 + $0x70] sm:$0xff]  }
 0x1e4   :  { %1682 = vst.msk [vmem:[%s3235_s4 + $0x38] sm:$0xf] %vm1667_vm4, %v1915_v6  ;;  %v1916_v42 = vpack.c.bf16 %v1362_v35, %v1362_v35 }
 0x1e5   :  { %1680 = vst.msk [vmem:[%s3235_s4 + $0x30] sm:$0xf] %vm1667_vm4, %v1913_v39  ;;  %v1914_v54 = vpack.c.bf16 %v1360_v24, %v1360_v24  ;;  %v2288_v5 = vpop.f32.mrb[16].mxu1  ;;  %v2027_v24 = vunpack.c.l.bf16 %v2107_v25 }
 0x1e6   :  { %1683 = vst.msk [vmem:[%s3235_s4 + $0x3c] sm:$0xf] %vm1667_vm4, %v1916_v42  ;;  %v1165_v37 = vadd.f32 %v2288_v5, %v2003_v11  ;;  %v1156_v38 = vpop.f32.mrb[17].mxu1  ;;  %v2028_v5 = vunpack.c.h.bf16 %v2107_v25 }
 0x1e7   :  { %1681 = vst.msk [vmem:[%s3235_s4 + $0x34] sm:$0xf] %vm1667_vm4, %v1914_v54  ;;  %v1157_v44 = vadd.f32 %v1999_v53, %v1156_v38  ;;  %v2289_v45 = vpop.f32.mrb[18].mxu1  ;;  %v2024_v38 = vunpack.c.h.bf16 %v2106_v43 }
 0x1e8   :  { %v1365_v50 = vmax.f32 %v1165_v37, 0.0  ;;  %v1168_v51 = vadd.f32 %v2289_v45, %v2004_v55  ;;  %v1159_v52 = vpop.f32.mrb[19].mxu1  ;;  %v2023_v55 = vunpack.c.l.bf16 %v2106_v43 }
 0x1e9   :  { %v1363_v57 = vmax.f32 %v1157_v44, 0.0  ;;  %v1160_v58 = vadd.f32 %v2000_v36, %v1159_v52 }
 0x1ea   :  { %v1919_v59 = vpack.c.bf16 %v1365_v50, %v1365_v50  ;;  %v1366_v63 = vmax.f32 %v1168_v51, 0.0  ;;  %v2109_v51 = vld [vmem:[%s3234_s3 + $0x88] sm:$0xff]  }
 0x1eb   :  { %v1917_v1 = vpack.c.bf16 %v1363_v57, %v1363_v57  ;;  %v1364_v2 = vmax.f32 %v1160_v58, 0.0  ;;  %v2108_v58 = vld [vmem:[%s3234_s3 + $0x80] sm:$0xff]  }
 0x1ec   :  { %1686 = vst.msk [vmem:[%s3235_s4 + $0x48] sm:$0xf] %vm1667_vm4, %v1919_v59  ;;  %v1920_v8 = vpack.c.bf16 %v1366_v63, %v1366_v63 }
 0x1ed   :  { %1684 = vst.msk [vmem:[%s3235_s4 + $0x40] sm:$0xf] %vm1667_vm4, %v1917_v1  ;;  %v1918_v10 = vpack.c.bf16 %v1364_v2, %v1364_v2  ;;  %v2292_v14 = vpop.f32.mrb[20].mxu1  ;;  %v2035_v2 = vunpack.c.l.bf16 %v2109_v51 }
 0x1ee   :  { %1687 = vst.msk [vmem:[%s3235_s4 + $0x4c] sm:$0xf] %vm1667_vm4, %v1920_v8  ;;  %v1181_v16 = vadd.f32 %v2292_v14, %v2011_v0  ;;  %v1172_v17 = vpop.f32.mrb[21].mxu1  ;;  %v2036_v14 = vunpack.c.h.bf16 %v2109_v51 }
 0x1ef   :  { %1685 = vst.msk [vmem:[%s3235_s4 + $0x44] sm:$0xf] %vm1667_vm4, %v1918_v10  ;;  %v1173_v21 = vadd.f32 %v2007_v7, %v1172_v17  ;;  %v2293_v22 = vpop.f32.mrb[22].mxu1  ;;  %v2032_v17 = vunpack.c.h.bf16 %v2108_v58 }
 0x1f0   :  { %v1369_v28 = vmax.f32 %v1181_v16, 0.0  ;;  %v1184_v31 = vadd.f32 %v2293_v22, %v2012_v9  ;;  %v1175_v32 = vpop.f32.mrb[23].mxu1  ;;  %v2031_v9 = vunpack.c.l.bf16 %v2108_v58 }
 0x1f1   :  { %v1367_v34 = vmax.f32 %v1173_v21, 0.0  ;;  %v1176_v41 = vadd.f32 %v2008_v15, %v1175_v32 }
 0x1f2   :  { %v1923_v46 = vpack.c.bf16 %v1369_v28, %v1369_v28  ;;  %v1370_v47 = vmax.f32 %v1184_v31, 0.0  ;;  %v2111_v31 = vld [vmem:[%s3234_s3 + $0x98] sm:$0xff]  }
 0x1f3   :  { %v1921_v61 = vpack.c.bf16 %v1367_v34, %v1367_v34  ;;  %v1368_v62 = vmax.f32 %v1176_v41, 0.0  ;;  %v2110_v41 = vld [vmem:[%s3234_s3 + $0x90] sm:$0xff]  }
 0x1f4   :  { %1690 = vst.msk [vmem:[%s3235_s4 + $0x58] sm:$0xf] %vm1667_vm4, %v1923_v46  ;;  %v1924_v4 = vpack.c.bf16 %v1370_v47, %v1370_v47 }
 0x1f5   :  { %1688 = vst.msk [vmem:[%s3235_s4 + $0x50] sm:$0xf] %vm1667_vm4, %v1921_v61  ;;  %v1922_v13 = vpack.c.bf16 %v1368_v62, %v1368_v62  ;;  %v2296_v18 = vpop.f32.mrb[24].mxu1  ;;  %v2043_v62 = vunpack.c.l.bf16 %v2111_v31 }
 0x1f6   :  { %1691 = vst.msk [vmem:[%s3235_s4 + $0x5c] sm:$0xf] %vm1667_vm4, %v1924_v4  ;;  %v1197_v20 = vadd.f32 %v2296_v18, %v2019_v48  ;;  %v1188_v29 = vpop.f32.mrb[25].mxu1  ;;  %v2044_v18 = vunpack.c.h.bf16 %v2111_v31 }
 0x1f7   :  { %1689 = vst.msk [vmem:[%s3235_s4 + $0x54] sm:$0xf] %vm1667_vm4, %v1922_v13  ;;  %v1189_v30 = vadd.f32 %v2015_v3, %v1188_v29  ;;  %v2297_v40 = vpop.f32.mrb[26].mxu1  ;;  %v2040_v29 = vunpack.c.h.bf16 %v2110_v41 }
 0x1f8   :  { %v1373_v60 = vmax.f32 %v1197_v20, 0.0  ;;  %v1200_v26 = vadd.f32 %v2297_v40, %v2020_v12  ;;  %v1191_v27 = vpop.f32.mrb[27].mxu1  ;;  %v2039_v12 = vunpack.c.l.bf16 %v2110_v41 }
 0x1f9   :  { %v1371_v6 = vmax.f32 %v1189_v30, 0.0  ;;  %v1192_v35 = vadd.f32 %v2016_v19, %v1191_v27 }
 0x1fa   :  { %v1927_v11 = vpack.c.bf16 %v1373_v60, %v1373_v60  ;;  %v1374_v39 = vmax.f32 %v1200_v26, 0.0  ;;  %v2113_v26 = vld [vmem:[%s3234_s3 + $0xa8] sm:$0xff]  }
 0x1fb   :  { %v1925_v53 = vpack.c.bf16 %v1371_v6, %v1371_v6  ;;  %v1372_v42 = vmax.f32 %v1192_v35, 0.0  ;;  %v2112_v35 = vld [vmem:[%s3234_s3 + $0xa0] sm:$0xff]  }
 0x1fc   :  { %1694 = vst.msk [vmem:[%s3235_s4 + $0x68] sm:$0xf] %vm1667_vm4, %v1927_v11  ;;  %v1928_v54 = vpack.c.bf16 %v1374_v39, %v1374_v39 }
 0x1fd   :  { %1692 = vst.msk [vmem:[%s3235_s4 + $0x60] sm:$0xf] %vm1667_vm4, %v1925_v53  ;;  %v1926_v36 = vpack.c.bf16 %v1372_v42, %v1372_v42  ;;  %v2300_v37 = vpop.f32.mrb[28].mxu1  ;;  %v2051_v42 = vunpack.c.l.bf16 %v2113_v26 }
 0x1fe   :  { %1695 = vst.msk [vmem:[%s3235_s4 + $0x6c] sm:$0xf] %vm1667_vm4, %v1928_v54  ;;  %v1213_v44 = vadd.f32 %v2300_v37, %v2027_v24  ;;  %v1204_v45 = vpop.f32.mrb[29].mxu1  ;;  %v2052_v37 = vunpack.c.h.bf16 %v2113_v26 }
 0x1ff   :  { %1693 = vst.msk [vmem:[%s3235_s4 + $0x64] sm:$0xf] %vm1667_vm4, %v1926_v36  ;;  %v1205_v49 = vadd.f32 %v2023_v55, %v1204_v45  ;;  %v2301_v50 = vpop.f32.mrb[30].mxu1  ;;  %v2048_v45 = vunpack.c.h.bf16 %v2112_v35 }
 0x200   :  { %v1377_v52 = vmax.f32 %v1213_v44, 0.0  ;;  %v1216_v56 = vadd.f32 %v2301_v50, %v2028_v5  ;;  %v1207_v57 = vpop.f32.mrb[31].mxu1  ;;  %v2047_v5 = vunpack.c.l.bf16 %v2112_v35 }
 0x201   :  { %v1375_v59 = vmax.f32 %v1205_v49, 0.0  ;;  %v1208_v63 = vadd.f32 %v2024_v38, %v1207_v57 }
 0x202   :  { %v1931_v0 = vpack.c.bf16 %v1377_v52, %v1377_v52  ;;  %v1378_v1 = vmax.f32 %v1216_v56, 0.0  ;;  %v2115_v56 = vld [vmem:[%s3234_s3 + $0xb8] sm:$0xff]  }
 0x203   :  { %v1929_v7 = vpack.c.bf16 %v1375_v59, %v1375_v59  ;;  %v1376_v8 = vmax.f32 %v1208_v63, 0.0  ;;  %v2114_v63 = vld [vmem:[%s3234_s3 + $0xb0] sm:$0xff]  }
 0x204   :  { %1698 = vst.msk [vmem:[%s3235_s4 + $0x78] sm:$0xf] %vm1667_vm4, %v1931_v0  ;;  %v1932_v10 = vpack.c.bf16 %v1378_v1, %v1378_v1 }
 0x205   :  { %1696 = vst.msk [vmem:[%s3235_s4 + $0x70] sm:$0xf] %vm1667_vm4, %v1929_v7  ;;  %v1930_v15 = vpack.c.bf16 %v1376_v8, %v1376_v8  ;;  %v2304_v16 = vpop.f32.mrb[32].mxu1  ;;  %v2059_v8 = vunpack.c.l.bf16 %v2115_v56 }
 0x206   :  { %1699 = vst.msk [vmem:[%s3235_s4 + $0x7c] sm:$0xf] %vm1667_vm4, %v1932_v10  ;;  %v1229_v21 = vadd.f32 %v2304_v16, %v2035_v2  ;;  %v1220_v22 = vpop.f32.mrb[33].mxu1  ;;  %v2060_v16 = vunpack.c.h.bf16 %v2115_v56 }
 0x207   :  { %1697 = vst.msk [vmem:[%s3235_s4 + $0x74] sm:$0xf] %vm1667_vm4, %v1930_v15  ;;  %v1221_v23 = vadd.f32 %v2031_v9, %v1220_v22  ;;  %v2305_v28 = vpop.f32.mrb[34].mxu1  ;;  %v2056_v22 = vunpack.c.h.bf16 %v2114_v63 }
 0x208   :  { %v1381_v32 = vmax.f32 %v1229_v21, 0.0  ;;  %v1232_v33 = vadd.f32 %v2305_v28, %v2036_v14  ;;  %v1223_v34 = vpop.f32.mrb[35].mxu1  ;;  %v2055_v14 = vunpack.c.l.bf16 %v2114_v63 }
 0x209   :  { %v1379_v46 = vmax.f32 %v1221_v23, 0.0  ;;  %v1224_v47 = vadd.f32 %v2032_v17, %v1223_v34 }
 0x20a   :  { %v1935_v48 = vpack.c.bf16 %v1381_v32, %v1381_v32  ;;  %v1382_v61 = vmax.f32 %v1232_v33, 0.0  ;;  %v2117_v33 = vld [vmem:[%s3234_s3 + $0xc8] sm:$0xff]  }
 0x20b   :  { %v1933_v3 = vpack.c.bf16 %v1379_v46, %v1379_v46  ;;  %v1380_v4 = vmax.f32 %v1224_v47, 0.0  ;;  %v2116_v47 = vld [vmem:[%s3234_s3 + $0xc0] sm:$0xff]  }
 0x20c   :  { %1702 = vst.msk [vmem:[%s3235_s4 + $0x88] sm:$0xf] %vm1667_vm4, %v1935_v48  ;;  %v1936_v13 = vpack.c.bf16 %v1382_v61, %v1382_v61 }
 0x20d   :  { %1700 = vst.msk [vmem:[%s3235_s4 + $0x80] sm:$0xf] %vm1667_vm4, %v1933_v3  ;;  %v1934_v19 = vpack.c.bf16 %v1380_v4, %v1380_v4  ;;  %v2308_v20 = vpop.f32.mrb[36].mxu1  ;;  %v2067_v4 = vunpack.c.l.bf16 %v2117_v33 }
 0x20e   :  { %1703 = vst.msk [vmem:[%s3235_s4 + $0x8c] sm:$0xf] %vm1667_vm4, %v1936_v13  ;;  %v1245_v30 = vadd.f32 %v2308_v20, %v2043_v62  ;;  %v1236_v40 = vpop.f32.mrb[37].mxu1  ;;  %v2068_v20 = vunpack.c.h.bf16 %v2117_v33 }
 0x20f   :  { %1701 = vst.msk [vmem:[%s3235_s4 + $0x84] sm:$0xf] %vm1667_vm4, %v1934_v19  ;;  %v1237_v25 = vadd.f32 %v2039_v12, %v1236_v40  ;;  %v2309_v60 = vpop.f32.mrb[38].mxu1  ;;  %v2064_v40 = vunpack.c.h.bf16 %v2116_v47 }
 0x210   :  { %v1385_v27 = vmax.f32 %v1245_v30, 0.0  ;;  %v1248_v43 = vadd.f32 %v2309_v60, %v2044_v18  ;;  %v1239_v6 = vpop.f32.mrb[39].mxu1  ;;  %v2063_v18 = vunpack.c.l.bf16 %v2116_v47 }
 0x211   :  { %v1383_v11 = vmax.f32 %v1237_v25, 0.0  ;;  %v1240_v39 = vadd.f32 %v2040_v29, %v1239_v6 }
 0x212   :  { %v1939_v24 = vpack.c.bf16 %v1385_v27, %v1385_v27  ;;  %v1386_v53 = vmax.f32 %v1248_v43, 0.0  ;;  %v2119_v43 = vld [vmem:[%s3234_s3 + $0xd8] sm:$0xff]  }
 0x213   :  { %v1937_v55 = vpack.c.bf16 %v1383_v11, %v1383_v11  ;;  %v1384_v54 = vmax.f32 %v1240_v39, 0.0  ;;  %v2118_v39 = vld [vmem:[%s3234_s3 + $0xd0] sm:$0xff]  }
 0x214   :  { %1706 = vst.msk [vmem:[%s3235_s4 + $0x98] sm:$0xf] %vm1667_vm4, %v1939_v24  ;;  %v1940_v36 = vpack.c.bf16 %v1386_v53, %v1386_v53 }
 0x215   :  { %1704 = vst.msk [vmem:[%s3235_s4 + $0x90] sm:$0xf] %vm1667_vm4, %v1937_v55  ;;  %v1938_v38 = vpack.c.bf16 %v1384_v54, %v1384_v54  ;;  %v2312_v44 = vpop.f32.mrb[40].mxu1  ;;  %v2075_v54 = vunpack.c.l.bf16 %v2119_v43 }
 0x216   :  { %1707 = vst.msk [vmem:[%s3235_s4 + $0x9c] sm:$0xf] %vm1667_vm4, %v1940_v36  ;;  %v1261_v49 = vadd.f32 %v2312_v44, %v2051_v42  ;;  %v1252_v50 = vpop.f32.mrb[41].mxu1  ;;  %v2076_v44 = vunpack.c.h.bf16 %v2119_v43 }
 0x217   :  { %1705 = vst.msk [vmem:[%s3235_s4 + $0x94] sm:$0xf] %vm1667_vm4, %v1938_v38  ;;  %v1253_v51 = vadd.f32 %v2047_v5, %v1252_v50  ;;  %v2313_v52 = vpop.f32.mrb[42].mxu1  ;;  %v2072_v50 = vunpack.c.h.bf16 %v2118_v39 }
 0x218   :  { %v1389_v57 = vmax.f32 %v1261_v49, 0.0  ;;  %v1264_v58 = vadd.f32 %v2313_v52, %v2052_v37  ;;  %v1255_v59 = vpop.f32.mrb[43].mxu1  ;;  %v2071_v37 = vunpack.c.l.bf16 %v2118_v39 }
 0x219   :  { %v1387_v0 = vmax.f32 %v1253_v51, 0.0  ;;  %v1256_v1 = vadd.f32 %v2048_v45, %v1255_v59 }
 0x21a   :  { %v1943_v2 = vpack.c.bf16 %v1389_v57, %v1389_v57  ;;  %v1390_v7 = vmax.f32 %v1264_v58, 0.0  ;;  %v2121_v58 = vld [vmem:[%s3234_s3 + $0xe8] sm:$0xff]  }
 0x21b   :  { %v1941_v9 = vpack.c.bf16 %v1387_v0, %v1387_v0  ;;  %v1388_v10 = vmax.f32 %v1256_v1, 0.0  ;;  %v2120_v1 = vld [vmem:[%s3234_s3 + $0xe0] sm:$0xff]  }
 0x21c   :  { %1710 = vst.msk [vmem:[%s3235_s4 + $0xa8] sm:$0xf] %vm1667_vm4, %v1943_v2  ;;  %v1944_v15 = vpack.c.bf16 %v1390_v7, %v1390_v7 }
 0x21d   :  { %1708 = vst.msk [vmem:[%s3235_s4 + $0xa0] sm:$0xf] %vm1667_vm4, %v1941_v9  ;;  %v1942_v17 = vpack.c.bf16 %v1388_v10, %v1388_v10  ;;  %v2316_v21 = vpop.f32.mrb[44].mxu1  ;;  %v2083_v10 = vunpack.c.l.bf16 %v2121_v58 }
 0x21e   :  { %1711 = vst.msk [vmem:[%s3235_s4 + $0xac] sm:$0xf] %vm1667_vm4, %v1944_v15  ;;  %v1277_v23 = vadd.f32 %v2316_v21, %v2059_v8  ;;  %v1268_v28 = vpop.f32.mrb[45].mxu1  ;;  %v2084_v21 = vunpack.c.h.bf16 %v2121_v58 }
 0x21f   :  { %1709 = vst.msk [vmem:[%s3235_s4 + $0xa4] sm:$0xf] %vm1667_vm4, %v1942_v17  ;;  %v1269_v31 = vadd.f32 %v2055_v14, %v1268_v28  ;;  %v2317_v32 = vpop.f32.mrb[46].mxu1  ;;  %v2080_v28 = vunpack.c.h.bf16 %v2120_v1 }
 0x220   :  { %v1393_v34 = vmax.f32 %v1277_v23, 0.0  ;;  %v1280_v41 = vadd.f32 %v2317_v32, %v2060_v16  ;;  %v1271_v46 = vpop.f32.mrb[47].mxu1  ;;  %v2079_v16 = vunpack.c.l.bf16 %v2120_v1 }
 0x221   :  { %v1391_v48 = vmax.f32 %v1269_v31, 0.0  ;;  %v1272_v61 = vadd.f32 %v2056_v22, %v1271_v46 }
 0x222   :  { %v1947_v62 = vpack.c.bf16 %v1393_v34, %v1393_v34  ;;  %v1394_v3 = vmax.f32 %v1280_v41, 0.0  ;;  %v2123_v41 = vld [vmem:[%s3234_s3 + $0xf8] sm:$0xff]  }
 0x223   :  { %v1945_v12 = vpack.c.bf16 %v1391_v48, %v1391_v48  ;;  %v1392_v13 = vmax.f32 %v1272_v61, 0.0  ;;  %v2122_v61 = vld [vmem:[%s3234_s3 + $0xf0] sm:$0xff]  }
 0x224   :  { %1714 = vst.msk [vmem:[%s3235_s4 + $0xb8] sm:$0xf] %vm1667_vm4, %v1947_v62  ;;  %v1948_v19 = vpack.c.bf16 %v1394_v3, %v1394_v3 }
 0x225   :  { %1712 = vst.msk [vmem:[%s3235_s4 + $0xb0] sm:$0xf] %vm1667_vm4, %v1945_v12  ;;  %v1946_v29 = vpack.c.bf16 %v1392_v13, %v1392_v13  ;;  %v2320_v30 = vpop.f32.mrb[48].mxu1  ;;  %v2091_v13 = vunpack.c.l.bf16 %v2123_v41 }
 0x226   :  { %1715 = vst.msk [vmem:[%s3235_s4 + $0xbc] sm:$0xf] %vm1667_vm4, %v1948_v19  ;;  %v1293_v25 = vadd.f32 %v2320_v30, %v2067_v4  ;;  %v1284_v60 = vpop.f32.mrb[49].mxu1  ;;  %v2092_v30 = vunpack.c.h.bf16 %v2123_v41 }
 0x227   :  { %1713 = vst.msk [vmem:[%s3235_s4 + $0xb4] sm:$0xf] %vm1667_vm4, %v1946_v29  ;;  %v1285_v26 = vadd.f32 %v2063_v18, %v1284_v60  ;;  %v2321_v27 = vpop.f32.mrb[50].mxu1  ;;  %v2088_v60 = vunpack.c.h.bf16 %v2122_v61 }
 0x228   :  { %v1397_v6 = vmax.f32 %v1293_v25, 0.0  ;;  %v1296_v35 = vadd.f32 %v2321_v27, %v2068_v20  ;;  %v1287_v11 = vpop.f32.mrb[51].mxu1  ;;  %v2087_v20 = vunpack.c.l.bf16 %v2122_v61 }
 0x229   :  { %v1395_v24 = vmax.f32 %v1285_v26, 0.0  ;;  %v1288_v53 = vadd.f32 %v2064_v40, %v1287_v11 }
 0x22a   :  { %v1951_v42 = vpack.c.bf16 %v1397_v6, %v1397_v6  ;;  %v1398_v55 = vmax.f32 %v1296_v35, 0.0 }
 0x22b   :  { %v1949_v5 = vpack.c.bf16 %v1395_v24, %v1395_v24  ;;  %v1396_v36 = vmax.f32 %v1288_v53, 0.0 }
 0x22c   :  { %1718 = vst.msk [vmem:[%s3235_s4 + $0xc8] sm:$0xf] %vm1667_vm4, %v1951_v42  ;;  %v1952_v38 = vpack.c.bf16 %v1398_v55, %v1398_v55 }
 0x22d   :  { %1716 = vst.msk [vmem:[%s3235_s4 + $0xc0] sm:$0xf] %vm1667_vm4, %v1949_v5  ;;  %v1950_v45 = vpack.c.bf16 %v1396_v36, %v1396_v36  ;;  %v2324_v49 = vpop.f32.mrb[52].mxu1 }
 0x22e   :  { %1719 = vst.msk [vmem:[%s3235_s4 + $0xcc] sm:$0xf] %vm1667_vm4, %v1952_v38  ;;  %v1309_v51 = vadd.f32 %v2324_v49, %v2075_v54  ;;  %v1300_v52 = vpop.f32.mrb[53].mxu1 }
 0x22f   :  { %1717 = vst.msk [vmem:[%s3235_s4 + $0xc4] sm:$0xf] %vm1667_vm4, %v1950_v45  ;;  %v1301_v56 = vadd.f32 %v2071_v37, %v1300_v52  ;;  %v2325_v57 = vpop.f32.mrb[54].mxu1 }
 0x230   :  { %v1401_v59 = vmax.f32 %v1309_v51, 0.0  ;;  %v1312_v63 = vadd.f32 %v2325_v57, %v2076_v44  ;;  %v1303_v0 = vpop.f32.mrb[55].mxu1 }
 0x231   :  { %v1399_v2 = vmax.f32 %v1301_v56, 0.0  ;;  %v1304_v7 = vadd.f32 %v2072_v50, %v1303_v0 }
 0x232   :  { %v1955_v8 = vpack.c.bf16 %v1401_v59, %v1401_v59  ;;  %v1402_v9 = vmax.f32 %v1312_v63, 0.0 }
 0x233   :  { %v1953_v14 = vpack.c.bf16 %v1399_v2, %v1399_v2  ;;  %v1400_v15 = vmax.f32 %v1304_v7, 0.0 }
 0x234   :  { %1722 = vst.msk [vmem:[%s3235_s4 + $0xd8] sm:$0xf] %vm1667_vm4, %v1955_v8  ;;  %v1956_v17 = vpack.c.bf16 %v1402_v9, %v1402_v9 }
 0x235   :  { %1720 = vst.msk [vmem:[%s3235_s4 + $0xd0] sm:$0xf] %vm1667_vm4, %v1953_v14  ;;  %v1954_v22 = vpack.c.bf16 %v1400_v15, %v1400_v15  ;;  %v2328_v23 = vpop.f32.mrb[56].mxu1 }
 0x236   :  { %1723 = vst.msk [vmem:[%s3235_s4 + $0xdc] sm:$0xf] %vm1667_vm4, %v1956_v17  ;;  %v1325_v31 = vadd.f32 %v2328_v23, %v2083_v10  ;;  %v1316_v32 = vpop.f32.mrb[57].mxu1 }
 0x237   :  { %1721 = vst.msk [vmem:[%s3235_s4 + $0xd4] sm:$0xf] %vm1667_vm4, %v1954_v22  ;;  %v1317_v33 = vadd.f32 %v2079_v16, %v1316_v32  ;;  %v2329_v34 = vpop.f32.mrb[58].mxu1 }
 0x238   :  { %v1405_v46 = vmax.f32 %v1325_v31, 0.0  ;;  %v1328_v47 = vadd.f32 %v2329_v34, %v2084_v21  ;;  %v1319_v48 = vpop.f32.mrb[59].mxu1 }
 0x239   :  { %v1403_v62 = vmax.f32 %v1317_v33, 0.0  ;;  %v1320_v3 = vadd.f32 %v2080_v28, %v1319_v48 }
 0x23a   :  { %v1959_v4 = vpack.c.bf16 %v1405_v46, %v1405_v46  ;;  %v1406_v12 = vmax.f32 %v1328_v47, 0.0 }
 0x23b   :  { %v1957_v18 = vpack.c.bf16 %v1403_v62, %v1403_v62  ;;  %v1404_v19 = vmax.f32 %v1320_v3, 0.0 }
 0x23c   :  { %1726 = vst.msk [vmem:[%s3235_s4 + $0xe8] sm:$0xf] %vm1667_vm4, %v1959_v4  ;;  %v1960_v29 = vpack.c.bf16 %v1406_v12, %v1406_v12 }
 0x23d   :  { %1724 = vst.msk [vmem:[%s3235_s4 + $0xe0] sm:$0xf] %vm1667_vm4, %v1957_v18  ;;  %v1958_v40 = vpack.c.bf16 %v1404_v19, %v1404_v19  ;;  %v2332_v25 = vpop.f32.mrb[60].mxu1 }
 0x23e   :  { %1727 = vst.msk [vmem:[%s3235_s4 + $0xec] sm:$0xf] %vm1667_vm4, %v1960_v29  ;;  %v1341_v26 = vadd.f32 %v2332_v25, %v2091_v13  ;;  %v1332_v27 = vpop.f32.mrb[61].mxu1 }
 0x23f   :  { %1725 = vst.msk [vmem:[%s3235_s4 + $0xe4] sm:$0xf] %vm1667_vm4, %v1958_v40  ;;  %v1333_v43 = vadd.f32 %v2087_v20, %v1332_v27  ;;  %v2333_v6 = vpop.f32.mrb[62].mxu1 }
 0x240   :  { %v1409_v35 = vmax.f32 %v1341_v26, 0.0  ;;  %v1344_v11 = vadd.f32 %v2333_v6, %v2092_v30  ;;  %v1335_v39 = vpop.f32.mrb[63].mxu1 }
 0x241   :  { %v1407_v24 = vmax.f32 %v1333_v43, 0.0  ;;  %v1336_v53 = vadd.f32 %v2088_v60, %v1335_v39 }
 0x242   :  { %v1963_v42 = vpack.c.bf16 %v1409_v35, %v1409_v35  ;;  %v1410_v55 = vmax.f32 %v1344_v11, 0.0 }
 0x243   :  { %v1961_v54 = vpack.c.bf16 %v1407_v24, %v1407_v24  ;;  %v1408_v5 = vmax.f32 %v1336_v53, 0.0 }
 0x244   :  { %1730 = vst.msk [vmem:[%s3235_s4 + $0xf8] sm:$0xf] %vm1667_vm4, %v1963_v42  ;;  %v1964_v36 = vpack.c.bf16 %v1410_v55, %v1410_v55 }
 0x245   :  { %1728 = vst.msk [vmem:[%s3235_s4 + $0xf0] sm:$0xf] %vm1667_vm4, %v1961_v54  ;;  %v1962_v37 = vpack.c.bf16 %v1408_v5, %v1408_v5 }
 0x246   :  { %1731 = vst.msk [vmem:[%s3235_s4 + $0xfc] sm:$0xf] %vm1667_vm4, %v1964_v36 }
 0x247   :  { %1729 = vst.msk [vmem:[%s3235_s4 + $0xf4] sm:$0xf] %vm1667_vm4, %v1962_v37 }

// kernel: vq_decoder2d_forward.3
= control target key start
LH: loop header
LB: loop body
LE: loop exit
PB: predicated region body
PF: predicated region fallthrough
CT: control target
= control target key end

     0   :  { %vm282_vm0 = vcmask 588800   ;;  %vm379_vm1 = vcmask 1043456   ;;  %vm672_vm2 = vcmask 261120   ;;  %s1459_s1 = inlined_call_operand.vmem [shape: bf16[72,32], index: 1, kind: input, shape index: {}]   ;;  %s1460_s0 = inlined_call_operand.vmem [shape: bf16[512,72], index: 0, kind: input, shape index: {}]   ;;  %s1461_s2 = inlined_call_operand.vmem [shape: f32[1,32], index: 2, kind: input, shape index: {}]   ;;  %s1462_s3 = inlined_call_operand.vmem [shape: f32[512,32], index: 3, kind: output, shape index: {}]  }
   0x1   :  { %v934_v0 = vld [vmem:[%s1459_s1] sm:$0xff]   ;;  %v935_v1 = vld [vmem:[%s1459_s1 + $0x8] sm:$0xff]   ;;  %v936_v2 = vld [vmem:[%s1459_s1 + $0x10] sm:$0xff]  }
   0x2   :  { %848 = vmatprep.subr.bf16.mxu0 %v934_v0  ;;  %922 = vmatprep.subr.bf16.mxu1 %v934_v0  ;;  %v939_v3 = vld [vmem:[%s1460_s0] sm:$0xff]   ;;  %v937_v5 = vld [vmem:[%s1459_s1 + $0x18] sm:$0xff]   ;;  %v941_v8 = vld [vmem:[%s1460_s0 + $0x8] sm:$0xff]  }
   0x3   :  { %849 = vmatpush3.bf16.msra.mxu0 %v934_v0  ;;  %927 = vmatpush3.bf16.msra.mxu1 %v934_v0  ;;  %v940_v4 = vld [vmem:[%s1460_s0 + $0x80] sm:$0xff]   ;;  %v942_v9 = vld [vmem:[%s1460_s0 + $0x88] sm:$0xff]   ;;  %v943_v10 = vld [vmem:[%s1460_s0 + $0x10] sm:$0xff]  }
   0x4   :  { %850 = vmatprep.subr.bf16.mxu0 %v935_v1  ;;  %923 = vmatprep.subr.bf16.mxu1 %v935_v1  ;;  %v938_v6 = vld [vmem:[%s1459_s1 + $0x20] ss:$0 sps:$4 sm:$0xff]   ;;  %v944_v11 = vld [vmem:[%s1460_s0 + $0x90] sm:$0xff]   ;;  %v945_v12 = vld [vmem:[%s1460_s0 + $0x18] sm:$0xff]  }
   0x5   :  { %858 = vmatprep.mubr.msk.bf16.mxu0 %vm282_vm0, %v939_v3  ;;  %890 = vmatprep.mubr.msk.bf16.mxu1 %vm282_vm0, %v940_v4  ;;  %v381_v7 = vsel %vm379_vm1, %v938_v6, 0  ;;  %v946_v13 = vld [vmem:[%s1460_s0 + $0x98] sm:$0xff]   ;;  %v947_v14 = vld [vmem:[%s1460_s0 + $0x20] sm:$0xff]   ;;  %v949_v16 = vld [vmem:[%s1460_s0 + $0x28] sm:$0xff]  }
   0x6   :  { %v948_v15 = vld [vmem:[%s1460_s0 + $0xa0] sm:$0xff]   ;;  %v950_v17 = vld [vmem:[%s1460_s0 + $0xa8] sm:$0xff]   ;;  %v951_v18 = vld [vmem:[%s1460_s0 + $0x30] sm:$0xff]  }
   0x7   :  { %851 = vmatpush3.bf16.msra.mxu0 %v935_v1  ;;  %928 = vmatpush3.bf16.msra.mxu1 %v935_v1  ;;  %v952_v19 = vld [vmem:[%s1460_s0 + $0xb0] sm:$0xff]   ;;  %v953_v20 = vld [vmem:[%s1460_s0 + $0x38] sm:$0xff]   ;;  %v955_v22 = vld [vmem:[%s1460_s0 + $0x40] sm:$0xff]  }
   0x8   :  { %852 = vmatprep.subr.bf16.mxu0 %v936_v2  ;;  %924 = vmatprep.subr.bf16.mxu1 %v936_v2  ;;  %v954_v21 = vld [vmem:[%s1460_s0 + $0xb8] sm:$0xff]   ;;  %v956_v23 = vld [vmem:[%s1460_s0 + $0xc0] sm:$0xff]   ;;  %v957_v24 = vld [vmem:[%s1460_s0 + $0x48] sm:$0xff]  }
   0x9   :  { %v958_v25 = vld [vmem:[%s1460_s0 + $0xc8] sm:$0xff]   ;;  %v959_v26 = vld [vmem:[%s1460_s0 + $0x50] sm:$0xff]   ;;  %v961_v28 = vld [vmem:[%s1460_s0 + $0x58] sm:$0xff]  }
   0xa   :  { %v960_v27 = vld [vmem:[%s1460_s0 + $0xd0] sm:$0xff]   ;;  %v962_v29 = vld [vmem:[%s1460_s0 + $0xd8] sm:$0xff]   ;;  %v963_v30 = vld [vmem:[%s1460_s0 + $0x60] sm:$0xff]  }
   0xb   :  { %853 = vmatpush3.bf16.msra.mxu0 %v936_v2  ;;  %929 = vmatpush3.bf16.msra.mxu1 %v936_v2  ;;  %v964_v31 = vld [vmem:[%s1460_s0 + $0xe0] sm:$0xff]   ;;  %v965_v32 = vld [vmem:[%s1460_s0 + $0x68] sm:$0xff]   ;;  %v967_v34 = vld [vmem:[%s1460_s0 + $0x70] sm:$0xff]  }
   0xc   :  { %854 = vmatprep.subr.bf16.mxu0 %v937_v5  ;;  %925 = vmatprep.subr.bf16.mxu1 %v937_v5  ;;  %v966_v33 = vld [vmem:[%s1460_s0 + $0xe8] sm:$0xff]   ;;  %v968_v35 = vld [vmem:[%s1460_s0 + $0xf0] sm:$0xff]   ;;  %v969_v36 = vld [vmem:[%s1460_s0 + $0x78] sm:$0xff]  }
   0xd   :  { %v970_v37 = vld [vmem:[%s1460_s0 + $0xf8] sm:$0xff]   ;;  %v1137_v38 = vld [vmem:[%s1461_s2] ss:$0 sm:$0xff] }
   0xf   :  { %855 = vmatpush3.bf16.msra.mxu0 %v937_v5  ;;  %930 = vmatpush3.bf16.msra.mxu1 %v937_v5 }
  0x10   :  { %932 = vmatprep.subr.msk.bf16.mxu0 %vm379_vm1, %v938_v6  ;;  %933 = vmatprep.subr.msk.bf16.mxu1 %vm379_vm1, %v938_v6 }
  0x13   :  { %857 = vmatpush3.bf16.msra.mxu0 %v381_v7  ;;  %931 = vmatpush3.bf16.msra.mxu1 %v381_v7 }
  0x16   :  { %859 = vmatmul.mubr.msk.bf16.vlgmr.msra.gmra.mrb[0].mxu0 %vm282_vm0, %v941_v8  ;;  %891 = vmatmul.mubr.msk.bf16.vlgmr.msra.gmra.mrb[0].mxu1 %vm282_vm0, %v942_v9 }
  0x17   :  { %862 = vmatprep.mubr.msk.bf16.mxu0 %vm282_vm0, %v943_v10  ;;  %894 = vmatprep.mubr.msk.bf16.mxu1 %vm282_vm0, %v944_v11 }
  0x1e   :  { %863 = vmatmul.mubr.msk.bf16.gmra.mrb[4].mxu0 %vm282_vm0, %v945_v12  ;;  %895 = vmatmul.mubr.msk.bf16.gmra.mrb[4].mxu1 %vm282_vm0, %v946_v13 }
  0x1f   :  { %866 = vmatprep.mubr.msk.bf16.mxu0 %vm282_vm0, %v947_v14  ;;  %898 = vmatprep.mubr.msk.bf16.mxu1 %vm282_vm0, %v948_v15 }
  0x26   :  { %867 = vmatmul.mubr.msk.bf16.gmra.mrb[8].mxu0 %vm282_vm0, %v949_v16  ;;  %899 = vmatmul.mubr.msk.bf16.gmra.mrb[8].mxu1 %vm282_vm0, %v950_v17 }
  0x27   :  { %870 = vmatprep.mubr.msk.bf16.mxu0 %vm282_vm0, %v951_v18  ;;  %902 = vmatprep.mubr.msk.bf16.mxu1 %vm282_vm0, %v952_v19 }
  0x2e   :  { %871 = vmatmul.mubr.msk.bf16.gmra.mrb[12].mxu0 %vm282_vm0, %v953_v20  ;;  %903 = vmatmul.mubr.msk.bf16.gmra.mrb[12].mxu1 %vm282_vm0, %v954_v21 }
  0x2f   :  { %874 = vmatprep.mubr.msk.bf16.mxu0 %vm282_vm0, %v955_v22  ;;  %906 = vmatprep.mubr.msk.bf16.mxu1 %vm282_vm0, %v956_v23 }
  0x36   :  { %875 = vmatmul.mubr.msk.bf16.gmra.mrb[16].mxu0 %vm282_vm0, %v957_v24  ;;  %907 = vmatmul.mubr.msk.bf16.gmra.mrb[16].mxu1 %vm282_vm0, %v958_v25 }
  0x37   :  { %878 = vmatprep.mubr.msk.bf16.mxu0 %vm282_vm0, %v959_v26  ;;  %910 = vmatprep.mubr.msk.bf16.mxu1 %vm282_vm0, %v960_v27 }
  0x3e   :  { %879 = vmatmul.mubr.msk.bf16.gmra.mrb[20].mxu0 %vm282_vm0, %v961_v28  ;;  %911 = vmatmul.mubr.msk.bf16.gmra.mrb[20].mxu1 %vm282_vm0, %v962_v29 }
  0x3f   :  { %882 = vmatprep.mubr.msk.bf16.mxu0 %vm282_vm0, %v963_v30  ;;  %914 = vmatprep.mubr.msk.bf16.mxu1 %vm282_vm0, %v964_v31 }
  0x46   :  { %883 = vmatmul.mubr.msk.bf16.gmra.mrb[24].mxu0 %vm282_vm0, %v965_v32  ;;  %915 = vmatmul.mubr.msk.bf16.gmra.mrb[24].mxu1 %vm282_vm0, %v966_v33 }
  0x47   :  { %886 = vmatprep.mubr.msk.bf16.mxu0 %vm282_vm0, %v967_v34  ;;  %918 = vmatprep.mubr.msk.bf16.mxu1 %vm282_vm0, %v968_v35 }
  0x4e   :  { %887 = vmatmul.mubr.msk.bf16.gmra.mrb[28].mxu0 %vm282_vm0, %v969_v36  ;;  %919 = vmatmul.mubr.msk.bf16.gmra.mrb[28].mxu1 %vm282_vm0, %v970_v37 }
  0xe9   :  { %v860_v39 = vpop.f32.mrb[0].mxu0  ;;  %v892_v40 = vpop.f32.mrb[0].mxu1 }
  0xea   :  { %v426_v41 = vadd.f32 %v860_v39, %v1137_v38  ;;  %v554_v42 = vadd.f32 %v892_v40, %v1137_v38  ;;  %v417_v43 = vpop.f32.mrb[1].mxu0  ;;  %v545_v44 = vpop.f32.mrb[1].mxu1 }
  0xeb   :  { %v418_v45 = vadd.f32 %v1137_v38, %v417_v43  ;;  %v546_v46 = vadd.f32 %v1137_v38, %v545_v44  ;;  %v861_v47 = vpop.f32.mrb[2].mxu0  ;;  %v893_v48 = vpop.f32.mrb[2].mxu1 }
  0xec   :  { %675 = vst.msk [vmem:[%s1462_s3 + $0x10] sm:$0xff] %vm672_vm2, %v426_v41  ;;  %707 = vst.msk [vmem:[%s1462_s3 + $0x110] sm:$0xff] %vm672_vm2, %v554_v42  ;;  %v429_v49 = vadd.f32 %v861_v47, %v1137_v38  ;;  %v557_v50 = vadd.f32 %v893_v48, %v1137_v38  ;;  %v420_v51 = vpop.f32.mrb[3].mxu0  ;;  %v548_v52 = vpop.f32.mrb[3].mxu1 }
  0xed   :  { %673 = vst.msk [vmem:[%s1462_s3] sm:$0xff] %vm672_vm2, %v418_v45  ;;  %705 = vst.msk [vmem:[%s1462_s3 + $0x100] sm:$0xff] %vm672_vm2, %v546_v46  ;;  %v421_v53 = vadd.f32 %v1137_v38, %v420_v51  ;;  %v549_v54 = vadd.f32 %v1137_v38, %v548_v52 }
  0xee   :  { %676 = vst.msk [vmem:[%s1462_s3 + $0x18] sm:$0xff] %vm672_vm2, %v429_v49  ;;  %708 = vst.msk [vmem:[%s1462_s3 + $0x118] sm:$0xff] %vm672_vm2, %v557_v50 }
  0xef   :  { %674 = vst.msk [vmem:[%s1462_s3 + $0x8] sm:$0xff] %vm672_vm2, %v421_v53  ;;  %706 = vst.msk [vmem:[%s1462_s3 + $0x108] sm:$0xff] %vm672_vm2, %v549_v54 }
  0xf1   :  { %v864_v55 = vpop.f32.mrb[4].mxu0  ;;  %v896_v56 = vpop.f32.mrb[4].mxu1 }
  0xf2   :  { %v442_v57 = vadd.f32 %v864_v55, %v1137_v38  ;;  %v570_v58 = vadd.f32 %v896_v56, %v1137_v38  ;;  %v433_v59 = vpop.f32.mrb[5].mxu0  ;;  %v561_v60 = vpop.f32.mrb[5].mxu1 }
  0xf3   :  { %v434_v61 = vadd.f32 %v1137_v38, %v433_v59  ;;  %v562_v62 = vadd.f32 %v1137_v38, %v561_v60  ;;  %v865_v63 = vpop.f32.mrb[6].mxu0  ;;  %v897_v0 = vpop.f32.mrb[6].mxu1 }
  0xf4   :  { %679 = vst.msk [vmem:[%s1462_s3 + $0x30] sm:$0xff] %vm672_vm2, %v442_v57  ;;  %711 = vst.msk [vmem:[%s1462_s3 + $0x130] sm:$0xff] %vm672_vm2, %v570_v58  ;;  %v445_v1 = vadd.f32 %v865_v63, %v1137_v38  ;;  %v573_v2 = vadd.f32 %v897_v0, %v1137_v38  ;;  %v436_v3 = vpop.f32.mrb[7].mxu0  ;;  %v564_v4 = vpop.f32.mrb[7].mxu1 }
  0xf5   :  { %677 = vst.msk [vmem:[%s1462_s3 + $0x20] sm:$0xff] %vm672_vm2, %v434_v61  ;;  %709 = vst.msk [vmem:[%s1462_s3 + $0x120] sm:$0xff] %vm672_vm2, %v562_v62  ;;  %v437_v5 = vadd.f32 %v1137_v38, %v436_v3  ;;  %v565_v6 = vadd.f32 %v1137_v38, %v564_v4 }
  0xf6   :  { %680 = vst.msk [vmem:[%s1462_s3 + $0x38] sm:$0xff] %vm672_vm2, %v445_v1  ;;  %712 = vst.msk [vmem:[%s1462_s3 + $0x138] sm:$0xff] %vm672_vm2, %v573_v2 }
  0xf7   :  { %678 = vst.msk [vmem:[%s1462_s3 + $0x28] sm:$0xff] %vm672_vm2, %v437_v5  ;;  %710 = vst.msk [vmem:[%s1462_s3 + $0x128] sm:$0xff] %vm672_vm2, %v565_v6 }
  0xf9   :  { %v868_v7 = vpop.f32.mrb[8].mxu0  ;;  %v900_v8 = vpop.f32.mrb[8].mxu1 }
  0xfa   :  { %v458_v9 = vadd.f32 %v868_v7, %v1137_v38  ;;  %v586_v10 = vadd.f32 %v900_v8, %v1137_v38  ;;  %v449_v11 = vpop.f32.mrb[9].mxu0  ;;  %v577_v12 = vpop.f32.mrb[9].mxu1 }
  0xfb   :  { %v450_v13 = vadd.f32 %v1137_v38, %v449_v11  ;;  %v578_v14 = vadd.f32 %v1137_v38, %v577_v12  ;;  %v869_v15 = vpop.f32.mrb[10].mxu0  ;;  %v901_v16 = vpop.f32.mrb[10].mxu1 }
  0xfc   :  { %683 = vst.msk [vmem:[%s1462_s3 + $0x50] sm:$0xff] %vm672_vm2, %v458_v9  ;;  %715 = vst.msk [vmem:[%s1462_s3 + $0x150] sm:$0xff] %vm672_vm2, %v586_v10  ;;  %v461_v17 = vadd.f32 %v869_v15, %v1137_v38  ;;  %v589_v18 = vadd.f32 %v901_v16, %v1137_v38  ;;  %v452_v19 = vpop.f32.mrb[11].mxu0  ;;  %v580_v20 = vpop.f32.mrb[11].mxu1 }
  0xfd   :  { %681 = vst.msk [vmem:[%s1462_s3 + $0x40] sm:$0xff] %vm672_vm2, %v450_v13  ;;  %713 = vst.msk [vmem:[%s1462_s3 + $0x140] sm:$0xff] %vm672_vm2, %v578_v14  ;;  %v453_v21 = vadd.f32 %v1137_v38, %v452_v19  ;;  %v581_v22 = vadd.f32 %v1137_v38, %v580_v20 }
  0xfe   :  { %684 = vst.msk [vmem:[%s1462_s3 + $0x58] sm:$0xff] %vm672_vm2, %v461_v17  ;;  %716 = vst.msk [vmem:[%s1462_s3 + $0x158] sm:$0xff] %vm672_vm2, %v589_v18 }
  0xff   :  { %682 = vst.msk [vmem:[%s1462_s3 + $0x48] sm:$0xff] %vm672_vm2, %v453_v21  ;;  %714 = vst.msk [vmem:[%s1462_s3 + $0x148] sm:$0xff] %vm672_vm2, %v581_v22 }
 0x101   :  { %v872_v23 = vpop.f32.mrb[12].mxu0  ;;  %v904_v24 = vpop.f32.mrb[12].mxu1 }
 0x102   :  { %v474_v25 = vadd.f32 %v872_v23, %v1137_v38  ;;  %v602_v26 = vadd.f32 %v904_v24, %v1137_v38  ;;  %v465_v27 = vpop.f32.mrb[13].mxu0  ;;  %v593_v28 = vpop.f32.mrb[13].mxu1 }
 0x103   :  { %v466_v29 = vadd.f32 %v1137_v38, %v465_v27  ;;  %v594_v30 = vadd.f32 %v1137_v38, %v593_v28  ;;  %v873_v31 = vpop.f32.mrb[14].mxu0  ;;  %v905_v32 = vpop.f32.mrb[14].mxu1 }
 0x104   :  { %687 = vst.msk [vmem:[%s1462_s3 + $0x70] sm:$0xff] %vm672_vm2, %v474_v25  ;;  %719 = vst.msk [vmem:[%s1462_s3 + $0x170] sm:$0xff] %vm672_vm2, %v602_v26  ;;  %v477_v33 = vadd.f32 %v873_v31, %v1137_v38  ;;  %v605_v34 = vadd.f32 %v905_v32, %v1137_v38  ;;  %v468_v35 = vpop.f32.mrb[15].mxu0  ;;  %v596_v36 = vpop.f32.mrb[15].mxu1 }
 0x105   :  { %685 = vst.msk [vmem:[%s1462_s3 + $0x60] sm:$0xff] %vm672_vm2, %v466_v29  ;;  %717 = vst.msk [vmem:[%s1462_s3 + $0x160] sm:$0xff] %vm672_vm2, %v594_v30  ;;  %v469_v37 = vadd.f32 %v1137_v38, %v468_v35  ;;  %v597_v39 = vadd.f32 %v1137_v38, %v596_v36 }
 0x106   :  { %688 = vst.msk [vmem:[%s1462_s3 + $0x78] sm:$0xff] %vm672_vm2, %v477_v33  ;;  %720 = vst.msk [vmem:[%s1462_s3 + $0x178] sm:$0xff] %vm672_vm2, %v605_v34 }
 0x107   :  { %686 = vst.msk [vmem:[%s1462_s3 + $0x68] sm:$0xff] %vm672_vm2, %v469_v37  ;;  %718 = vst.msk [vmem:[%s1462_s3 + $0x168] sm:$0xff] %vm672_vm2, %v597_v39 }
 0x109   :  { %v876_v40 = vpop.f32.mrb[16].mxu0  ;;  %v908_v41 = vpop.f32.mrb[16].mxu1 }
 0x10a   :  { %v490_v42 = vadd.f32 %v876_v40, %v1137_v38  ;;  %v618_v43 = vadd.f32 %v908_v41, %v1137_v38  ;;  %v481_v44 = vpop.f32.mrb[17].mxu0  ;;  %v609_v45 = vpop.f32.mrb[17].mxu1 }
 0x10b   :  { %v482_v46 = vadd.f32 %v1137_v38, %v481_v44  ;;  %v610_v47 = vadd.f32 %v1137_v38, %v609_v45  ;;  %v877_v48 = vpop.f32.mrb[18].mxu0  ;;  %v909_v49 = vpop.f32.mrb[18].mxu1 }
 0x10c   :  { %691 = vst.msk [vmem:[%s1462_s3 + $0x90] sm:$0xff] %vm672_vm2, %v490_v42  ;;  %723 = vst.msk [vmem:[%s1462_s3 + $0x190] sm:$0xff] %vm672_vm2, %v618_v43  ;;  %v493_v50 = vadd.f32 %v877_v48, %v1137_v38  ;;  %v621_v51 = vadd.f32 %v909_v49, %v1137_v38  ;;  %v484_v52 = vpop.f32.mrb[19].mxu0  ;;  %v612_v53 = vpop.f32.mrb[19].mxu1 }
 0x10d   :  { %689 = vst.msk [vmem:[%s1462_s3 + $0x80] sm:$0xff] %vm672_vm2, %v482_v46  ;;  %721 = vst.msk [vmem:[%s1462_s3 + $0x180] sm:$0xff] %vm672_vm2, %v610_v47  ;;  %v485_v54 = vadd.f32 %v1137_v38, %v484_v52  ;;  %v613_v55 = vadd.f32 %v1137_v38, %v612_v53 }
 0x10e   :  { %692 = vst.msk [vmem:[%s1462_s3 + $0x98] sm:$0xff] %vm672_vm2, %v493_v50  ;;  %724 = vst.msk [vmem:[%s1462_s3 + $0x198] sm:$0xff] %vm672_vm2, %v621_v51 }
 0x10f   :  { %690 = vst.msk [vmem:[%s1462_s3 + $0x88] sm:$0xff] %vm672_vm2, %v485_v54  ;;  %722 = vst.msk [vmem:[%s1462_s3 + $0x188] sm:$0xff] %vm672_vm2, %v613_v55 }
 0x111   :  { %v880_v56 = vpop.f32.mrb[20].mxu0  ;;  %v912_v57 = vpop.f32.mrb[20].mxu1 }
 0x112   :  { %v506_v58 = vadd.f32 %v880_v56, %v1137_v38  ;;  %v634_v59 = vadd.f32 %v912_v57, %v1137_v38  ;;  %v497_v60 = vpop.f32.mrb[21].mxu0  ;;  %v625_v61 = vpop.f32.mrb[21].mxu1 }
 0x113   :  { %v498_v62 = vadd.f32 %v1137_v38, %v497_v60  ;;  %v626_v63 = vadd.f32 %v1137_v38, %v625_v61  ;;  %v881_v0 = vpop.f32.mrb[22].mxu0  ;;  %v913_v1 = vpop.f32.mrb[22].mxu1 }
 0x114   :  { %695 = vst.msk [vmem:[%s1462_s3 + $0xb0] sm:$0xff] %vm672_vm2, %v506_v58  ;;  %727 = vst.msk [vmem:[%s1462_s3 + $0x1b0] sm:$0xff] %vm672_vm2, %v634_v59  ;;  %v509_v2 = vadd.f32 %v881_v0, %v1137_v38  ;;  %v637_v3 = vadd.f32 %v913_v1, %v1137_v38  ;;  %v500_v4 = vpop.f32.mrb[23].mxu0  ;;  %v628_v5 = vpop.f32.mrb[23].mxu1 }
 0x115   :  { %693 = vst.msk [vmem:[%s1462_s3 + $0xa0] sm:$0xff] %vm672_vm2, %v498_v62  ;;  %725 = vst.msk [vmem:[%s1462_s3 + $0x1a0] sm:$0xff] %vm672_vm2, %v626_v63  ;;  %v501_v6 = vadd.f32 %v1137_v38, %v500_v4  ;;  %v629_v7 = vadd.f32 %v1137_v38, %v628_v5 }
 0x116   :  { %696 = vst.msk [vmem:[%s1462_s3 + $0xb8] sm:$0xff] %vm672_vm2, %v509_v2  ;;  %728 = vst.msk [vmem:[%s1462_s3 + $0x1b8] sm:$0xff] %vm672_vm2, %v637_v3 }
 0x117   :  { %694 = vst.msk [vmem:[%s1462_s3 + $0xa8] sm:$0xff] %vm672_vm2, %v501_v6  ;;  %726 = vst.msk [vmem:[%s1462_s3 + $0x1a8] sm:$0xff] %vm672_vm2, %v629_v7 }
 0x119   :  { %v884_v8 = vpop.f32.mrb[24].mxu0  ;;  %v916_v9 = vpop.f32.mrb[24].mxu1 }
 0x11a   :  { %v522_v10 = vadd.f32 %v884_v8, %v1137_v38  ;;  %v650_v11 = vadd.f32 %v916_v9, %v1137_v38  ;;  %v513_v12 = vpop.f32.mrb[25].mxu0  ;;  %v641_v13 = vpop.f32.mrb[25].mxu1 }
 0x11b   :  { %v514_v14 = vadd.f32 %v1137_v38, %v513_v12  ;;  %v642_v15 = vadd.f32 %v1137_v38, %v641_v13  ;;  %v885_v16 = vpop.f32.mrb[26].mxu0  ;;  %v917_v17 = vpop.f32.mrb[26].mxu1 }
 0x11c   :  { %699 = vst.msk [vmem:[%s1462_s3 + $0xd0] sm:$0xff] %vm672_vm2, %v522_v10  ;;  %731 = vst.msk [vmem:[%s1462_s3 + $0x1d0] sm:$0xff] %vm672_vm2, %v650_v11  ;;  %v525_v18 = vadd.f32 %v885_v16, %v1137_v38  ;;  %v653_v19 = vadd.f32 %v917_v17, %v1137_v38  ;;  %v516_v20 = vpop.f32.mrb[27].mxu0  ;;  %v644_v21 = vpop.f32.mrb[27].mxu1 }
 0x11d   :  { %697 = vst.msk [vmem:[%s1462_s3 + $0xc0] sm:$0xff] %vm672_vm2, %v514_v14  ;;  %729 = vst.msk [vmem:[%s1462_s3 + $0x1c0] sm:$0xff] %vm672_vm2, %v642_v15  ;;  %v517_v22 = vadd.f32 %v1137_v38, %v516_v20  ;;  %v645_v23 = vadd.f32 %v1137_v38, %v644_v21 }
 0x11e   :  { %700 = vst.msk [vmem:[%s1462_s3 + $0xd8] sm:$0xff] %vm672_vm2, %v525_v18  ;;  %732 = vst.msk [vmem:[%s1462_s3 + $0x1d8] sm:$0xff] %vm672_vm2, %v653_v19 }
 0x11f   :  { %698 = vst.msk [vmem:[%s1462_s3 + $0xc8] sm:$0xff] %vm672_vm2, %v517_v22  ;;  %730 = vst.msk [vmem:[%s1462_s3 + $0x1c8] sm:$0xff] %vm672_vm2, %v645_v23 }
 0x121   :  { %v888_v24 = vpop.f32.mrb[28].mxu0  ;;  %v920_v25 = vpop.f32.mrb[28].mxu1 }
 0x122   :  { %v538_v26 = vadd.f32 %v888_v24, %v1137_v38  ;;  %v666_v27 = vadd.f32 %v920_v25, %v1137_v38  ;;  %v529_v28 = vpop.f32.mrb[29].mxu0  ;;  %v657_v29 = vpop.f32.mrb[29].mxu1 }
 0x123   :  { %v530_v30 = vadd.f32 %v1137_v38, %v529_v28  ;;  %v658_v31 = vadd.f32 %v1137_v38, %v657_v29  ;;  %v889_v32 = vpop.f32.mrb[30].mxu0  ;;  %v921_v33 = vpop.f32.mrb[30].mxu1 }
 0x124   :  { %703 = vst.msk [vmem:[%s1462_s3 + $0xf0] sm:$0xff] %vm672_vm2, %v538_v26  ;;  %735 = vst.msk [vmem:[%s1462_s3 + $0x1f0] sm:$0xff] %vm672_vm2, %v666_v27  ;;  %v541_v34 = vadd.f32 %v889_v32, %v1137_v38  ;;  %v669_v35 = vadd.f32 %v921_v33, %v1137_v38  ;;  %v532_v36 = vpop.f32.mrb[31].mxu0  ;;  %v660_v37 = vpop.f32.mrb[31].mxu1 }
 0x125   :  { %701 = vst.msk [vmem:[%s1462_s3 + $0xe0] sm:$0xff] %vm672_vm2, %v530_v30  ;;  %733 = vst.msk [vmem:[%s1462_s3 + $0x1e0] sm:$0xff] %vm672_vm2, %v658_v31  ;;  %v533_v39 = vadd.f32 %v1137_v38, %v532_v36  ;;  %v661_v40 = vadd.f32 %v1137_v38, %v660_v37 }
 0x126   :  { %704 = vst.msk [vmem:[%s1462_s3 + $0xf8] sm:$0xff] %vm672_vm2, %v541_v34  ;;  %736 = vst.msk [vmem:[%s1462_s3 + $0x1f8] sm:$0xff] %vm672_vm2, %v669_v35 }
 0x127   :  { %702 = vst.msk [vmem:[%s1462_s3 + $0xe8] sm:$0xff] %vm672_vm2, %v533_v39  ;;  %734 = vst.msk [vmem:[%s1462_s3 + $0x1e8] sm:$0xff] %vm672_vm2, %v661_v40 }

</bundles_post_ra>
